<compile_context>
chip_gen: v7x
topology: tpu7x:2x2x1
jax: 0.10.0
libtpu: 0.0.40
codegen_flags: <defaults>
</compile_context>

<pallas_src>
import jax
import jax.numpy as jnp
from jax.experimental import pallas as pl
from jax.experimental.pallas import tpu as pltpu

INPUT_DIM = 6
HIDDEN_DIM = 16
NUM_LAYERS = 2
FC_OUT = 16
WINDOW_SIZE = 5


def _lstm_fc_wave_kernel(x2d_ref,    # ((T+1)*Bp, D) time-major, batch-padded, 1 zero step appended
                         wih0_ref,   # (D, 8H)  weight_ih_l0.T scattered into layer-0 gate cols
                         wwave_ref,  # (2H, 8H) fused wavefront weight (whh0 | wih1 | whh1)
                         gbias_ref,  # (1, 8H)  b0 in layer-0 cols, b1 in layer-1 cols
                         gscale_ref, # (1, 8H)  0.5 on i/f/o cols, 1.0 on g cols
                         gshift_ref, # (1, 8H)  0.5 on i/f/o cols, 0.0 on g cols
                         mask0_ref,  # (1, 2H)  1 on layer-0 half, 0 on layer-1 half
                         wfc_ref,    # (2H, 16) fc.weight.T in rows H:2H, zeros in rows 0:H
                         bfc_ref,    # (1, 16)  fc.bias
                         out_ref,    # (Bp, 16)
                         gx_ref):    # VMEM scratch ((T+1)*Bp, 8H)
    Bp = out_ref.shape[0]
    H2 = wwave_ref.shape[0]          # 2H
    H8 = wwave_ref.shape[1]          # 8H
    n_waves = gx_ref.shape[0] // Bp  # T + 1

    # One-shot, full-width input projection for all timesteps (independent of
    # the recurrent carry -> off the critical path), both layers' biases
    # folded into the appropriate gate columns.  Stored in VMEM scratch so the
    # unrolled recurrence keeps vreg pressure low.
    gx_ref[...] = (jnp.dot(x2d_ref[...], wih0_ref[...],
                           preferred_element_type=jnp.float32)
                   + gbias_ref[...])

    wwave = wwave_ref[...]
    gscale = jnp.broadcast_to(gscale_ref[...], (Bp, H8))   # hoisted broadcasts
    gshift = jnp.broadcast_to(gshift_ref[...], (Bp, H8))
    mask0 = jnp.broadcast_to(mask0_ref[...], (Bp, H2))

    def activate(gates):
        # Single EUP pass over the full (Bp, 8H) vreg:
        #   i/f/o columns: 0.5*tanh(0.5*x)+0.5 == sigmoid(x)
        #   g   columns:   tanh(x)
        # selected via the per-column scale/shift vectors.
        t = jnp.tanh(gates * gscale)
        a = t * gscale + gshift
        return (a[:, 0 * H2:1 * H2], a[:, 1 * H2:2 * H2],
                a[:, 2 * H2:3 * H2], a[:, 3 * H2:4 * H2])

    # Wave 0 (peeled): layer-0 step 0 only.  The recurrent carry is zero so no
    # dot is needed; the mask keeps the layer-1 half of c (and hence h, since
    # tanh(0)=0) at exactly zero so layer-1 starts from its true initial state.
    i, f, g, o = activate(gx_ref[0:Bp, :])
    c = (i * g) * mask0
    h = o * jnp.tanh(c)

    # Waves 1..T: ONE dependent MXU dot + ONE activation pass per wave.
    # h = [h0(w-1) | h1(w-2)], so the fused (2H, 8H) dot simultaneously yields
    # the recurrent gates of layer-0 step w and the full gates of layer-1
    # step w-1.  Fully unrolled: T is small/static and every slice is static.
    for w in range(1, n_waves):
        gates = gx_ref[w * Bp:(w + 1) * Bp, :] + jnp.dot(
            h, wwave, preferred_element_type=jnp.float32)
        i, f, g, o = activate(gates)
        c = f * c + i * g
        h = o * jnp.tanh(c)

    # fc head on h1(T-1).  The last wave's layer-0 half of h is a spurious
    # extra step; wfc has zero rows there, so it never contributes and no
    # lane-slicing of h is needed.
    out_ref[...] = (jnp.dot(h, wfc_ref[...],
                            preferred_element_type=jnp.float32)
                    + bfc_ref[...])


def temperature_encoder_forward(x, params):
    """x: (B, T, D_in) batch-first (PyTorch convention).  Returns (B, 16)."""
    B, T, D = x.shape
    H = HIDDEN_DIM
    Bp = ((B + 7) // 8) * 8  # pad batch to a sublane multiple (>= 8)

    x = x.astype(jnp.float32)
    # Time-major, batch-padded, plus ONE extra zero timestep for the final
    # (layer-1-only) wave; flattened so per-wave slices are sublane aligned.
    x_tm = jnp.transpose(x, (1, 0, 2))                       # (T, B, D)
    x_tm = jnp.pad(x_tm, ((0, 1), (0, Bp - B), (0, 0)))      # (T+1, Bp, D)
    x2d = x_tm.reshape((T + 1) * Bp, D)

    def scatter_cols(dst, src, layer):
        # Place per-layer [i|f|g|o] (..., 4H) columns into the interleaved
        # [i0 i1 | f0 f1 | g0 g1 | o0 o1] (..., 8H) layout.
        for k in range(4):
            dst = dst.at[..., (2 * k + layer) * H:(2 * k + layer + 1) * H].set(
                src[..., k * H:(k + 1) * H])
        return dst

    wih0 = params["weight_ih_l0"].T.astype(jnp.float32)   # (D, 4H)
    wih1 = params["weight_ih_l1"].T.astype(jnp.float32)   # (H, 4H)
    whh0 = params["weight_hh_l0"].T.astype(jnp.float32)   # (H, 4H)
    whh1 = params["weight_hh_l1"].T.astype(jnp.float32)   # (H, 4H)

    # Full-width input projection weight: layer-1 gate columns are zero.
    wih0_big = scatter_cols(jnp.zeros((D, 8 * H), jnp.float32), wih0, 0)

    # Fused wavefront weight: [h0 | h1] @ wwave produces
    #   layer-0 cols: h0 @ whh0.T        (recurrent gates of layer-0 step w)
    #   layer-1 cols: h0 @ wih1.T + h1 @ whh1.T  (full gates of layer-1 step w-1)
    wwave = jnp.zeros((2 * H, 8 * H), jnp.float32)
    wwave = wwave.at[:H, :].set(scatter_cols(
        scatter_cols(jnp.zeros((H, 8 * H), jnp.float32), whh0, 0), wih1, 1))
    wwave = wwave.at[H:, :].set(scatter_cols(
        jnp.zeros((H, 8 * H), jnp.float32), whh1, 1))

    b0 = (params["bias_ih_l0"] + params["bias_hh_l0"]).astype(jnp.float32)
    b1 = (params["bias_ih_l1"] + params["bias_hh_l1"]).astype(jnp.float32)
    gbias = scatter_cols(
        scatter_cols(jnp.zeros((1, 8 * H), jnp.float32), b0.reshape(1, 4 * H), 0),
        b1.reshape(1, 4 * H), 1)

    # Per-column EUP trick: sigmoid(x)=0.5*tanh(0.5*x)+0.5 on i/f/o columns,
    # plain tanh on the g columns ([4H:6H] in the interleaved layout).
    gscale = jnp.full((1, 8 * H), 0.5, jnp.float32).at[:, 4 * H:6 * H].set(1.0)
    gshift = jnp.full((1, 8 * H), 0.5, jnp.float32).at[:, 4 * H:6 * H].set(0.0)

    # Wave-0 mask: keep the layer-1 half of the cell state at zero.
    mask0 = jnp.zeros((1, 2 * H), jnp.float32).at[:, :H].set(1.0)

    # fc weight padded with zero rows for the layer-0 half of the h carry.
    wfc_pad = jnp.zeros((2 * H, FC_OUT), jnp.float32).at[H:, :].set(
        params["fc_weight"].T.astype(jnp.float32))
    bfc = params["fc_bias"].astype(jnp.float32).reshape(1, FC_OUT)

    vmem = pl.BlockSpec(memory_space=pltpu.MemorySpace.VMEM)
    out_padded = pl.pallas_call(
        _lstm_fc_wave_kernel,
        out_shape=jax.ShapeDtypeStruct((Bp, FC_OUT), jnp.float32),
        in_specs=[vmem] * 9,
        out_specs=vmem,
        scratch_shapes=[pltpu.VMEM(((T + 1) * Bp, 8 * H), jnp.float32)],
    )(x2d, wih0_big, wwave, gbias, gscale, gshift, mask0, wfc_pad, bfc)
    return out_padded[:B]


def _init_params(key):
    """Deterministic synthetic parameters with PyTorch LSTM/Linear shapes."""
    H, D = HIDDEN_DIM, INPUT_DIM
    ks = jax.random.split(key, 10)
    scale = 0.25  # ~ 1/sqrt(hidden_dim)
    return {
        "weight_ih_l0": scale * jax.random.normal(ks[0], (4 * H, D), jnp.float32),
        "weight_hh_l0": scale * jax.random.normal(ks[1], (4 * H, H), jnp.float32),
        "bias_ih_l0":   scale * jax.random.normal(ks[2], (4 * H,), jnp.float32),
        "bias_hh_l0":   scale * jax.random.normal(ks[3], (4 * H,), jnp.float32),
        "weight_ih_l1": scale * jax.random.normal(ks[4], (4 * H, H), jnp.float32),
        "weight_hh_l1": scale * jax.random.normal(ks[5], (4 * H, H), jnp.float32),
        "bias_ih_l1":   scale * jax.random.normal(ks[6], (4 * H,), jnp.float32),
        "bias_hh_l1":   scale * jax.random.normal(ks[7], (4 * H,), jnp.float32),
        "fc_weight":    scale * jax.random.normal(ks[8], (FC_OUT, H), jnp.float32),
        "fc_bias":      scale * jax.random.normal(ks[9], (FC_OUT,), jnp.float32),
    }


def _reference_forward(x, params):
    """Pure-JAX reference replicating torch.nn.LSTM (i,f,g,o) + Linear."""
    H = HIDDEN_DIM
    B = x.shape[0]

    def cell(x_t, h, c, w_ih, w_hh, b_ih, b_hh):
        g = x_t @ w_ih.T + h @ w_hh.T + b_ih + b_hh
        i = jax.nn.sigmoid(g[:, 0 * H:1 * H])
        f = jax.nn.sigmoid(g[:, 1 * H:2 * H])
        gg = jnp.tanh(g[:, 2 * H:3 * H])
        o = jax.nn.sigmoid(g[:, 3 * H:4 * H])
        c = f * c + i * gg
        h = o * jnp.tanh(c)
        return h, c

    h0 = c0 = h1 = c1 = jnp.zeros((B, H), jnp.float32)
    for t in range(x.shape[1]):
        x_t = x[:, t, :]
        h0, c0 = cell(x_t, h0, c0, params["weight_ih_l0"], params["weight_hh_l0"],
                      params["bias_ih_l0"], params["bias_hh_l0"])
        h1, c1 = cell(h0, h1, c1, params["weight_ih_l1"], params["weight_hh_l1"],
                      params["bias_ih_l1"], params["bias_hh_l1"])
    return h1 @ params["fc_weight"].T + params["fc_bias"]


if __name__ == "__main__":
    key = jax.random.PRNGKey(0)
    k_x, k_p = jax.random.split(key)

    B = 2
    T = WINDOW_SIZE * 6  # 30, matching the module docstring's (batch, 30, ...)
    x = jax.random.normal(k_x, (B, T, INPUT_DIM), jnp.float32)

    params = _init_params(k_p)

    out = temperature_encoder_forward(x, params)
    out = jax.block_until_ready(out)

    ref = _reference_forward(x, params)
    assert out.shape == (B, FC_OUT)
    assert jnp.allclose(out, ref, atol=1e-4, rtol=1e-4), "mismatch vs reference"

    print("KERNEL_OK")
</pallas_src>

<mosaic_0001>
module attributes {stable_mosaic.version = 11 : i64} {
  func.func @_lstm_fc_wave_kernel(%arg0: memref<248x6xf32, #tpu.memory_space<vmem>>, %arg1: memref<6x128xf32, #tpu.memory_space<vmem>>, %arg2: memref<32x128xf32, #tpu.memory_space<vmem>>, %arg3: memref<1x128xf32, #tpu.memory_space<vmem>>, %arg4: memref<1x128xf32, #tpu.memory_space<vmem>>, %arg5: memref<1x128xf32, #tpu.memory_space<vmem>>, %arg6: memref<1x32xf32, #tpu.memory_space<vmem>>, %arg7: memref<32x16xf32, #tpu.memory_space<vmem>>, %arg8: memref<1x16xf32, #tpu.memory_space<vmem>>, %arg9: memref<8x16xf32, #tpu.memory_space<vmem>>, %arg10: memref<248x128xf32, #tpu.memory_space<vmem>>) attributes {dimension_semantics = [], scalar_prefetch = 0 : i64, scratch_operands = 1 : i64, tpu.core_type = #tpu.core_type<tc>} {
    %c0 = arith.constant 0 : index
    %c0_0 = arith.constant 0 : index
    %0 = vector.load %arg0[%c0, %c0_0] : memref<248x6xf32, #tpu.memory_space<vmem>>, vector<248x6xf32>
    %c0_1 = arith.constant 0 : index
    %c0_2 = arith.constant 0 : index
    %1 = vector.load %arg1[%c0_1, %c0_2] : memref<6x128xf32, #tpu.memory_space<vmem>>, vector<6x128xf32>
    %cst = arith.constant dense<0.000000e+00> : vector<248x128xf32>
    %2 = tpu.matmul %0, %1, %cst {dimension_numbers = #tpu.dot_dimension_numbers<[1], [0], [0], [1], [0, 0, 1, 1], [], []>} : vector<248x6xf32>, vector<6x128xf32>, vector<248x128xf32> -> vector<248x128xf32>
    %c0_3 = arith.constant 0 : index
    %c0_4 = arith.constant 0 : index
    %3 = vector.load %arg3[%c0_3, %c0_4] : memref<1x128xf32, #tpu.memory_space<vmem>>, vector<1x128xf32>
    %4 = vector.broadcast %3 : vector<1x128xf32> to vector<248x128xf32>
    %5 = arith.addf %2, %4 : vector<248x128xf32>
    %c0_5 = arith.constant 0 : index
    %c0_6 = arith.constant 0 : index
    %6 = vector.load %arg10[%c0_5, %c0_6] : memref<248x128xf32, #tpu.memory_space<vmem>>, vector<248x128xf32>
    tpu.vector_store %arg10[%c0_5, %c0_6], %5 {strides = array<i32>} : memref<248x128xf32, #tpu.memory_space<vmem>>, vector<248x128xf32>,
    %c0_7 = arith.constant 0 : index
    %c0_8 = arith.constant 0 : index
    %7 = vector.load %arg2[%c0_7, %c0_8] : memref<32x128xf32, #tpu.memory_space<vmem>>, vector<32x128xf32>
    %c0_9 = arith.constant 0 : index
    %c0_10 = arith.constant 0 : index
    %8 = vector.load %arg4[%c0_9, %c0_10] : memref<1x128xf32, #tpu.memory_space<vmem>>, vector<1x128xf32>
    %9 = vector.shape_cast %8 : vector<1x128xf32> to vector<1x128xf32>
    %10 = vector.broadcast %9 : vector<1x128xf32> to vector<8x128xf32>
    %c0_11 = arith.constant 0 : index
    %c0_12 = arith.constant 0 : index
    %11 = vector.load %arg5[%c0_11, %c0_12] : memref<1x128xf32, #tpu.memory_space<vmem>>, vector<1x128xf32>
    %12 = vector.shape_cast %11 : vector<1x128xf32> to vector<1x128xf32>
    %13 = vector.broadcast %12 : vector<1x128xf32> to vector<8x128xf32>
    %c0_13 = arith.constant 0 : index
    %c0_14 = arith.constant 0 : index
    %14 = vector.load %arg6[%c0_13, %c0_14] : memref<1x32xf32, #tpu.memory_space<vmem>>, vector<1x32xf32>
    %15 = vector.shape_cast %14 : vector<1x32xf32> to vector<1x32xf32>
    %16 = vector.broadcast %15 : vector<1x32xf32> to vector<8x32xf32>
    %c0_15 = arith.constant 0 : index
    %c0_16 = arith.constant 0 : index
    %17 = vector.load %arg10[%c0_15, %c0_16] : memref<248x128xf32, #tpu.memory_space<vmem>>, vector<8x128xf32>
    %18 = arith.mulf %17, %10 : vector<8x128xf32>
    %19 = math.tanh %18 : vector<8x128xf32>
    %20 = arith.mulf %19, %10 : vector<8x128xf32>
    %21 = arith.addf %20, %13 : vector<8x128xf32>
    %22 = vector.extract_strided_slice %21 {offsets = [0, 0], sizes = [8, 32], strides = [1, 1]} : vector<8x128xf32> to vector<8x32xf32>
    %23 = vector.extract_strided_slice %21 {offsets = [0, 64], sizes = [8, 32], strides = [1, 1]} : vector<8x128xf32> to vector<8x32xf32>
    %24 = vector.extract_strided_slice %21 {offsets = [0, 96], sizes = [8, 32], strides = [1, 1]} : vector<8x128xf32> to vector<8x32xf32>
    %25 = arith.mulf %22, %23 : vector<8x32xf32>
    %26 = arith.mulf %25, %16 : vector<8x32xf32>
    %27 = math.tanh %26 : vector<8x32xf32>
    %28 = arith.mulf %24, %27 : vector<8x32xf32>
    %c8 = arith.constant 8 : index
    %c0_17 = arith.constant 0 : index
    %29 = vector.load %arg10[%c8, %c0_17] : memref<248x128xf32, #tpu.memory_space<vmem>>, vector<8x128xf32>
    %cst_18 = arith.constant dense<0.000000e+00> : vector<8x128xf32>
    %30 = tpu.matmul %28, %7, %cst_18 {dimension_numbers = #tpu.dot_dimension_numbers<[1], [0], [0], [1], [0, 0, 1, 1], [], []>} : vector<8x32xf32>, vector<32x128xf32>, vector<8x128xf32> -> vector<8x128xf32>
    %31 = arith.addf %29, %30 : vector<8x128xf32>
    %32 = arith.mulf %31, %10 : vector<8x128xf32>
    %33 = math.tanh %32 : vector<8x128xf32>
    %34 = arith.mulf %33, %10 : vector<8x128xf32>
    %35 = arith.addf %34, %13 : vector<8x128xf32>
    %36 = vector.extract_strided_slice %35 {offsets = [0, 0], sizes = [8, 32], strides = [1, 1]} : vector<8x128xf32> to vector<8x32xf32>
    %37 = vector.extract_strided_slice %35 {offsets = [0, 32], sizes = [8, 32], strides = [1, 1]} : vector<8x128xf32> to vector<8x32xf32>
    %38 = vector.extract_strided_slice %35 {offsets = [0, 64], sizes = [8, 32], strides = [1, 1]} : vector<8x128xf32> to vector<8x32xf32>
    %39 = vector.extract_strided_slice %35 {offsets = [0, 96], sizes = [8, 32], strides = [1, 1]} : vector<8x128xf32> to vector<8x32xf32>
    %40 = arith.mulf %37, %26 : vector<8x32xf32>
    %41 = arith.mulf %36, %38 : vector<8x32xf32>
    %42 = arith.addf %40, %41 : vector<8x32xf32>
    %43 = math.tanh %42 : vector<8x32xf32>
    %44 = arith.mulf %39, %43 : vector<8x32xf32>
    %c16 = arith.constant 16 : index
    %c0_19 = arith.constant 0 : index
    %45 = vector.load %arg10[%c16, %c0_19] : memref<248x128xf32, #tpu.memory_space<vmem>>, vector<8x128xf32>
    %cst_20 = arith.constant dense<0.000000e+00> : vector<8x128xf32>
    %46 = tpu.matmul %44, %7, %cst_20 {dimension_numbers = #tpu.dot_dimension_numbers<[1], [0], [0], [1], [0, 0, 1, 1], [], []>} : vector<8x32xf32>, vector<32x128xf32>, vector<8x128xf32> -> vector<8x128xf32>
    %47 = arith.addf %45, %46 : vector<8x128xf32>
    %48 = arith.mulf %47, %10 : vector<8x128xf32>
    %49 = math.tanh %48 : vector<8x128xf32>
    %50 = arith.mulf %49, %10 : vector<8x128xf32>
    %51 = arith.addf %50, %13 : vector<8x128xf32>
    %52 = vector.extract_strided_slice %51 {offsets = [0, 0], sizes = [8, 32], strides = [1, 1]} : vector<8x128xf32> to vector<8x32xf32>
    %53 = vector.extract_strided_slice %51 {offsets = [0, 32], sizes = [8, 32], strides = [1, 1]} : vector<8x128xf32> to vector<8x32xf32>
    %54 = vector.extract_strided_slice %51 {offsets = [0, 64], sizes = [8, 32], strides = [1, 1]} : vector<8x128xf32> to vector<8x32xf32>
    %55 = vector.extract_strided_slice %51 {offsets = [0, 96], sizes = [8, 32], strides = [1, 1]} : vector<8x128xf32> to vector<8x32xf32>
    %56 = arith.mulf %53, %42 : vector<8x32xf32>
    %57 = arith.mulf %52, %54 : vector<8x32xf32>
    %58 = arith.addf %56, %57 : vector<8x32xf32>
    %59 = math.tanh %58 : vector<8x32xf32>
    %60 = arith.mulf %55, %59 : vector<8x32xf32>
    %c24 = arith.constant 24 : index
    %c0_21 = arith.constant 0 : index
    %61 = vector.load %arg10[%c24, %c0_21] : memref<248x128xf32, #tpu.memory_space<vmem>>, vector<8x128xf32>
    %cst_22 = arith.constant dense<0.000000e+00> : vector<8x128xf32>
    %62 = tpu.matmul %60, %7, %cst_22 {dimension_numbers = #tpu.dot_dimension_numbers<[1], [0], [0], [1], [0, 0, 1, 1], [], []>} : vector<8x32xf32>, vector<32x128xf32>, vector<8x128xf32> -> vector<8x128xf32>
    %63 = arith.addf %61, %62 : vector<8x128xf32>
    %64 = arith.mulf %63, %10 : vector<8x128xf32>
    %65 = math.tanh %64 : vector<8x128xf32>
    %66 = arith.mulf %65, %10 : vector<8x128xf32>
    %67 = arith.addf %66, %13 : vector<8x128xf32>
    %68 = vector.extract_strided_slice %67 {offsets = [0, 0], sizes = [8, 32], strides = [1, 1]} : vector<8x128xf32> to vector<8x32xf32>
    %69 = vector.extract_strided_slice %67 {offsets = [0, 32], sizes = [8, 32], strides = [1, 1]} : vector<8x128xf32> to vector<8x32xf32>
    %70 = vector.extract_strided_slice %67 {offsets = [0, 64], sizes = [8, 32], strides = [1, 1]} : vector<8x128xf32> to vector<8x32xf32>
    %71 = vector.extract_strided_slice %67 {offsets = [0, 96], sizes = [8, 32], strides = [1, 1]} : vector<8x128xf32> to vector<8x32xf32>
    %72 = arith.mulf %69, %58 : vector<8x32xf32>
    %73 = arith.mulf %68, %70 : vector<8x32xf32>
    %74 = arith.addf %72, %73 : vector<8x32xf32>
    %75 = math.tanh %74 : vector<8x32xf32>
    %76 = arith.mulf %71, %75 : vector<8x32xf32>
    %c32 = arith.constant 32 : index
    %c0_23 = arith.constant 0 : index
    %77 = vector.load %arg10[%c32, %c0_23] : memref<248x128xf32, #tpu.memory_space<vmem>>, vector<8x128xf32>
    %cst_24 = arith.constant dense<0.000000e+00> : vector<8x128xf32>
    %78 = tpu.matmul %76, %7, %cst_24 {dimension_numbers = #tpu.dot_dimension_numbers<[1], [0], [0], [1], [0, 0, 1, 1], [], []>} : vector<8x32xf32>, vector<32x128xf32>, vector<8x128xf32> -> vector<8x128xf32>
    %79 = arith.addf %77, %78 : vector<8x128xf32>
    %80 = arith.mulf %79, %10 : vector<8x128xf32>
    %81 = math.tanh %80 : vector<8x128xf32>
    %82 = arith.mulf %81, %10 : vector<8x128xf32>
    %83 = arith.addf %82, %13 : vector<8x128xf32>
    %84 = vector.extract_strided_slice %83 {offsets = [0, 0], sizes = [8, 32], strides = [1, 1]} : vector<8x128xf32> to vector<8x32xf32>
    %85 = vector.extract_strided_slice %83 {offsets = [0, 32], sizes = [8, 32], strides = [1, 1]} : vector<8x128xf32> to vector<8x32xf32>
    %86 = vector.extract_strided_slice %83 {offsets = [0, 64], sizes = [8, 32], strides = [1, 1]} : vector<8x128xf32> to vector<8x32xf32>
    %87 = vector.extract_strided_slice %83 {offsets = [0, 96], sizes = [8, 32], strides = [1, 1]} : vector<8x128xf32> to vector<8x32xf32>
    %88 = arith.mulf %85, %74 : vector<8x32xf32>
    %89 = arith.mulf %84, %86 : vector<8x32xf32>
    %90 = arith.addf %88, %89 : vector<8x32xf32>
    %91 = math.tanh %90 : vector<8x32xf32>
    %92 = arith.mulf %87, %91 : vector<8x32xf32>
    %c40 = arith.constant 40 : index
    %c0_25 = arith.constant 0 : index
    %93 = vector.load %arg10[%c40, %c0_25] : memref<248x128xf32, #tpu.memory_space<vmem>>, vector<8x128xf32>
    %cst_26 = arith.constant dense<0.000000e+00> : vector<8x128xf32>
    %94 = tpu.matmul %92, %7, %cst_26 {dimension_numbers = #tpu.dot_dimension_numbers<[1], [0], [0], [1], [0, 0, 1, 1], [], []>} : vector<8x32xf32>, vector<32x128xf32>, vector<8x128xf32> -> vector<8x128xf32>
    %95 = arith.addf %93, %94 : vector<8x128xf32>
    %96 = arith.mulf %95, %10 : vector<8x128xf32>
    %97 = math.tanh %96 : vector<8x128xf32>
    %98 = arith.mulf %97, %10 : vector<8x128xf32>
    %99 = arith.addf %98, %13 : vector<8x128xf32>
    %100 = vector.extract_strided_slice %99 {offsets = [0, 0], sizes = [8, 32], strides = [1, 1]} : vector<8x128xf32> to vector<8x32xf32>
    %101 = vector.extract_strided_slice %99 {offsets = [0, 32], sizes = [8, 32], strides = [1, 1]} : vector<8x128xf32> to vector<8x32xf32>
    %102 = vector.extract_strided_slice %99 {offsets = [0, 64], sizes = [8, 32], strides = [1, 1]} : vector<8x128xf32> to vector<8x32xf32>
    %103 = vector.extract_strided_slice %99 {offsets = [0, 96], sizes = [8, 32], strides = [1, 1]} : vector<8x128xf32> to vector<8x32xf32>
    %104 = arith.mulf %101, %90 : vector<8x32xf32>
    %105 = arith.mulf %100, %102 : vector<8x32xf32>
    %106 = arith.addf %104, %105 : vector<8x32xf32>
    %107 = math.tanh %106 : vector<8x32xf32>
    %108 = arith.mulf %103, %107 : vector<8x32xf32>
    %c48 = arith.constant 48 : index
    %c0_27 = arith.constant 0 : index
    %109 = vector.load %arg10[%c48, %c0_27] : memref<248x128xf32, #tpu.memory_space<vmem>>, vector<8x128xf32>
    %cst_28 = arith.constant dense<0.000000e+00> : vector<8x128xf32>
    %110 = tpu.matmul %108, %7, %cst_28 {dimension_numbers = #tpu.dot_dimension_numbers<[1], [0], [0], [1], [0, 0, 1, 1], [], []>} : vector<8x32xf32>, vector<32x128xf32>, vector<8x128xf32> -> vector<8x128xf32>
    %111 = arith.addf %109, %110 : vector<8x128xf32>
    %112 = arith.mulf %111, %10 : vector<8x128xf32>
    %113 = math.tanh %112 : vector<8x128xf32>
    %114 = arith.mulf %113, %10 : vector<8x128xf32>
    %115 = arith.addf %114, %13 : vector<8x128xf32>
    %116 = vector.extract_strided_slice %115 {offsets = [0, 0], sizes = [8, 32], strides = [1, 1]} : vector<8x128xf32> to vector<8x32xf32>
    %117 = vector.extract_strided_slice %115 {offsets = [0, 32], sizes = [8, 32], strides = [1, 1]} : vector<8x128xf32> to vector<8x32xf32>
    %118 = vector.extract_strided_slice %115 {offsets = [0, 64], sizes = [8, 32], strides = [1, 1]} : vector<8x128xf32> to vector<8x32xf32>
    %119 = vector.extract_strided_slice %115 {offsets = [0, 96], sizes = [8, 32], strides = [1, 1]} : vector<8x128xf32> to vector<8x32xf32>
    %120 = arith.mulf %117, %106 : vector<8x32xf32>
    %121 = arith.mulf %116, %118 : vector<8x32xf32>
    %122 = arith.addf %120, %121 : vector<8x32xf32>
    %123 = math.tanh %122 : vector<8x32xf32>
    %124 = arith.mulf %119, %123 : vector<8x32xf32>
    %c56 = arith.constant 56 : index
    %c0_29 = arith.constant 0 : index
    %125 = vector.load %arg10[%c56, %c0_29] : memref<248x128xf32, #tpu.memory_space<vmem>>, vector<8x128xf32>
    %cst_30 = arith.constant dense<0.000000e+00> : vector<8x128xf32>
    %126 = tpu.matmul %124, %7, %cst_30 {dimension_numbers = #tpu.dot_dimension_numbers<[1], [0], [0], [1], [0, 0, 1, 1], [], []>} : vector<8x32xf32>, vector<32x128xf32>, vector<8x128xf32> -> vector<8x128xf32>
    %127 = arith.addf %125, %126 : vector<8x128xf32>
    %128 = arith.mulf %127, %10 : vector<8x128xf32>
    %129 = math.tanh %128 : vector<8x128xf32>
    %130 = arith.mulf %129, %10 : vector<8x128xf32>
    %131 = arith.addf %130, %13 : vector<8x128xf32>
    %132 = vector.extract_strided_slice %131 {offsets = [0, 0], sizes = [8, 32], strides = [1, 1]} : vector<8x128xf32> to vector<8x32xf32>
    %133 = vector.extract_strided_slice %131 {offsets = [0, 32], sizes = [8, 32], strides = [1, 1]} : vector<8x128xf32> to vector<8x32xf32>
    %134 = vector.extract_strided_slice %131 {offsets = [0, 64], sizes = [8, 32], strides = [1, 1]} : vector<8x128xf32> to vector<8x32xf32>
    %135 = vector.extract_strided_slice %131 {offsets = [0, 96], sizes = [8, 32], strides = [1, 1]} : vector<8x128xf32> to vector<8x32xf32>
    %136 = arith.mulf %133, %122 : vector<8x32xf32>
    %137 = arith.mulf %132, %134 : vector<8x32xf32>
    %138 = arith.addf %136, %137 : vector<8x32xf32>
    %139 = math.tanh %138 : vector<8x32xf32>
    %140 = arith.mulf %135, %139 : vector<8x32xf32>
    %c64 = arith.constant 64 : index
    %c0_31 = arith.constant 0 : index
    %141 = vector.load %arg10[%c64, %c0_31] : memref<248x128xf32, #tpu.memory_space<vmem>>, vector<8x128xf32>
    %cst_32 = arith.constant dense<0.000000e+00> : vector<8x128xf32>
    %142 = tpu.matmul %140, %7, %cst_32 {dimension_numbers = #tpu.dot_dimension_numbers<[1], [0], [0], [1], [0, 0, 1, 1], [], []>} : vector<8x32xf32>, vector<32x128xf32>, vector<8x128xf32> -> vector<8x128xf32>
    %143 = arith.addf %141, %142 : vector<8x128xf32>
    %144 = arith.mulf %143, %10 : vector<8x128xf32>
    %145 = math.tanh %144 : vector<8x128xf32>
    %146 = arith.mulf %145, %10 : vector<8x128xf32>
    %147 = arith.addf %146, %13 : vector<8x128xf32>
    %148 = vector.extract_strided_slice %147 {offsets = [0, 0], sizes = [8, 32], strides = [1, 1]} : vector<8x128xf32> to vector<8x32xf32>
    %149 = vector.extract_strided_slice %147 {offsets = [0, 32], sizes = [8, 32], strides = [1, 1]} : vector<8x128xf32> to vector<8x32xf32>
    %150 = vector.extract_strided_slice %147 {offsets = [0, 64], sizes = [8, 32], strides = [1, 1]} : vector<8x128xf32> to vector<8x32xf32>
    %151 = vector.extract_strided_slice %147 {offsets = [0, 96], sizes = [8, 32], strides = [1, 1]} : vector<8x128xf32> to vector<8x32xf32>
    %152 = arith.mulf %149, %138 : vector<8x32xf32>
    %153 = arith.mulf %148, %150 : vector<8x32xf32>
    %154 = arith.addf %152, %153 : vector<8x32xf32>
    %155 = math.tanh %154 : vector<8x32xf32>
    %156 = arith.mulf %151, %155 : vector<8x32xf32>
    %c72 = arith.constant 72 : index
    %c0_33 = arith.constant 0 : index
    %157 = vector.load %arg10[%c72, %c0_33] : memref<248x128xf32, #tpu.memory_space<vmem>>, vector<8x128xf32>
    %cst_34 = arith.constant dense<0.000000e+00> : vector<8x128xf32>
    %158 = tpu.matmul %156, %7, %cst_34 {dimension_numbers = #tpu.dot_dimension_numbers<[1], [0], [0], [1], [0, 0, 1, 1], [], []>} : vector<8x32xf32>, vector<32x128xf32>, vector<8x128xf32> -> vector<8x128xf32>
    %159 = arith.addf %157, %158 : vector<8x128xf32>
    %160 = arith.mulf %159, %10 : vector<8x128xf32>
    %161 = math.tanh %160 : vector<8x128xf32>
    %162 = arith.mulf %161, %10 : vector<8x128xf32>
    %163 = arith.addf %162, %13 : vector<8x128xf32>
    %164 = vector.extract_strided_slice %163 {offsets = [0, 0], sizes = [8, 32], strides = [1, 1]} : vector<8x128xf32> to vector<8x32xf32>
    %165 = vector.extract_strided_slice %163 {offsets = [0, 32], sizes = [8, 32], strides = [1, 1]} : vector<8x128xf32> to vector<8x32xf32>
    %166 = vector.extract_strided_slice %163 {offsets = [0, 64], sizes = [8, 32], strides = [1, 1]} : vector<8x128xf32> to vector<8x32xf32>
    %167 = vector.extract_strided_slice %163 {offsets = [0, 96], sizes = [8, 32], strides = [1, 1]} : vector<8x128xf32> to vector<8x32xf32>
    %168 = arith.mulf %165, %154 : vector<8x32xf32>
    %169 = arith.mulf %164, %166 : vector<8x32xf32>
    %170 = arith.addf %168, %169 : vector<8x32xf32>
    %171 = math.tanh %170 : vector<8x32xf32>
    %172 = arith.mulf %167, %171 : vector<8x32xf32>
    %c80 = arith.constant 80 : index
    %c0_35 = arith.constant 0 : index
    %173 = vector.load %arg10[%c80, %c0_35] : memref<248x128xf32, #tpu.memory_space<vmem>>, vector<8x128xf32>
    %cst_36 = arith.constant dense<0.000000e+00> : vector<8x128xf32>
    %174 = tpu.matmul %172, %7, %cst_36 {dimension_numbers = #tpu.dot_dimension_numbers<[1], [0], [0], [1], [0, 0, 1, 1], [], []>} : vector<8x32xf32>, vector<32x128xf32>, vector<8x128xf32> -> vector<8x128xf32>
    %175 = arith.addf %173, %174 : vector<8x128xf32>
    %176 = arith.mulf %175, %10 : vector<8x128xf32>
    %177 = math.tanh %176 : vector<8x128xf32>
    %178 = arith.mulf %177, %10 : vector<8x128xf32>
    %179 = arith.addf %178, %13 : vector<8x128xf32>
    %180 = vector.extract_strided_slice %179 {offsets = [0, 0], sizes = [8, 32], strides = [1, 1]} : vector<8x128xf32> to vector<8x32xf32>
    %181 = vector.extract_strided_slice %179 {offsets = [0, 32], sizes = [8, 32], strides = [1, 1]} : vector<8x128xf32> to vector<8x32xf32>
    %182 = vector.extract_strided_slice %179 {offsets = [0, 64], sizes = [8, 32], strides = [1, 1]} : vector<8x128xf32> to vector<8x32xf32>
    %183 = vector.extract_strided_slice %179 {offsets = [0, 96], sizes = [8, 32], strides = [1, 1]} : vector<8x128xf32> to vector<8x32xf32>
    %184 = arith.mulf %181, %170 : vector<8x32xf32>
    %185 = arith.mulf %180, %182 : vector<8x32xf32>
    %186 = arith.addf %184, %185 : vector<8x32xf32>
    %187 = math.tanh %186 : vector<8x32xf32>
    %188 = arith.mulf %183, %187 : vector<8x32xf32>
    %c88 = arith.constant 88 : index
    %c0_37 = arith.constant 0 : index
    %189 = vector.load %arg10[%c88, %c0_37] : memref<248x128xf32, #tpu.memory_space<vmem>>, vector<8x128xf32>
    %cst_38 = arith.constant dense<0.000000e+00> : vector<8x128xf32>
    %190 = tpu.matmul %188, %7, %cst_38 {dimension_numbers = #tpu.dot_dimension_numbers<[1], [0], [0], [1], [0, 0, 1, 1], [], []>} : vector<8x32xf32>, vector<32x128xf32>, vector<8x128xf32> -> vector<8x128xf32>
    %191 = arith.addf %189, %190 : vector<8x128xf32>
    %192 = arith.mulf %191, %10 : vector<8x128xf32>
    %193 = math.tanh %192 : vector<8x128xf32>
    %194 = arith.mulf %193, %10 : vector<8x128xf32>
    %195 = arith.addf %194, %13 : vector<8x128xf32>
    %196 = vector.extract_strided_slice %195 {offsets = [0, 0], sizes = [8, 32], strides = [1, 1]} : vector<8x128xf32> to vector<8x32xf32>
    %197 = vector.extract_strided_slice %195 {offsets = [0, 32], sizes = [8, 32], strides = [1, 1]} : vector<8x128xf32> to vector<8x32xf32>
    %198 = vector.extract_strided_slice %195 {offsets = [0, 64], sizes = [8, 32], strides = [1, 1]} : vector<8x128xf32> to vector<8x32xf32>
    %199 = vector.extract_strided_slice %195 {offsets = [0, 96], sizes = [8, 32], strides = [1, 1]} : vector<8x128xf32> to vector<8x32xf32>
    %200 = arith.mulf %197, %186 : vector<8x32xf32>
    %201 = arith.mulf %196, %198 : vector<8x32xf32>
    %202 = arith.addf %200, %201 : vector<8x32xf32>
    %203 = math.tanh %202 : vector<8x32xf32>
    %204 = arith.mulf %199, %203 : vector<8x32xf32>
    %c96 = arith.constant 96 : index
    %c0_39 = arith.constant 0 : index
    %205 = vector.load %arg10[%c96, %c0_39] : memref<248x128xf32, #tpu.memory_space<vmem>>, vector<8x128xf32>
    %cst_40 = arith.constant dense<0.000000e+00> : vector<8x128xf32>
    %206 = tpu.matmul %204, %7, %cst_40 {dimension_numbers = #tpu.dot_dimension_numbers<[1], [0], [0], [1], [0, 0, 1, 1], [], []>} : vector<8x32xf32>, vector<32x128xf32>, vector<8x128xf32> -> vector<8x128xf32>
    %207 = arith.addf %205, %206 : vector<8x128xf32>
    %208 = arith.mulf %207, %10 : vector<8x128xf32>
    %209 = math.tanh %208 : vector<8x128xf32>
    %210 = arith.mulf %209, %10 : vector<8x128xf32>
    %211 = arith.addf %210, %13 : vector<8x128xf32>
    %212 = vector.extract_strided_slice %211 {offsets = [0, 0], sizes = [8, 32], strides = [1, 1]} : vector<8x128xf32> to vector<8x32xf32>
    %213 = vector.extract_strided_slice %211 {offsets = [0, 32], sizes = [8, 32], strides = [1, 1]} : vector<8x128xf32> to vector<8x32xf32>
    %214 = vector.extract_strided_slice %211 {offsets = [0, 64], sizes = [8, 32], strides = [1, 1]} : vector<8x128xf32> to vector<8x32xf32>
    %215 = vector.extract_strided_slice %211 {offsets = [0, 96], sizes = [8, 32], strides = [1, 1]} : vector<8x128xf32> to vector<8x32xf32>
    %216 = arith.mulf %213, %202 : vector<8x32xf32>
    %217 = arith.mulf %212, %214 : vector<8x32xf32>
    %218 = arith.addf %216, %217 : vector<8x32xf32>
    %219 = math.tanh %218 : vector<8x32xf32>
    %220 = arith.mulf %215, %219 : vector<8x32xf32>
    %c104 = arith.constant 104 : index
    %c0_41 = arith.constant 0 : index
    %221 = vector.load %arg10[%c104, %c0_41] : memref<248x128xf32, #tpu.memory_space<vmem>>, vector<8x128xf32>
    %cst_42 = arith.constant dense<0.000000e+00> : vector<8x128xf32>
    %222 = tpu.matmul %220, %7, %cst_42 {dimension_numbers = #tpu.dot_dimension_numbers<[1], [0], [0], [1], [0, 0, 1, 1], [], []>} : vector<8x32xf32>, vector<32x128xf32>, vector<8x128xf32> -> vector<8x128xf32>
    %223 = arith.addf %221, %222 : vector<8x128xf32>
    %224 = arith.mulf %223, %10 : vector<8x128xf32>
    %225 = math.tanh %224 : vector<8x128xf32>
    %226 = arith.mulf %225, %10 : vector<8x128xf32>
    %227 = arith.addf %226, %13 : vector<8x128xf32>
    %228 = vector.extract_strided_slice %227 {offsets = [0, 0], sizes = [8, 32], strides = [1, 1]} : vector<8x128xf32> to vector<8x32xf32>
    %229 = vector.extract_strided_slice %227 {offsets = [0, 32], sizes = [8, 32], strides = [1, 1]} : vector<8x128xf32> to vector<8x32xf32>
    %230 = vector.extract_strided_slice %227 {offsets = [0, 64], sizes = [8, 32], strides = [1, 1]} : vector<8x128xf32> to vector<8x32xf32>
    %231 = vector.extract_strided_slice %227 {offsets = [0, 96], sizes = [8, 32], strides = [1, 1]} : vector<8x128xf32> to vector<8x32xf32>
    %232 = arith.mulf %229, %218 : vector<8x32xf32>
    %233 = arith.mulf %228, %230 : vector<8x32xf32>
    %234 = arith.addf %232, %233 : vector<8x32xf32>
    %235 = math.tanh %234 : vector<8x32xf32>
    %236 = arith.mulf %231, %235 : vector<8x32xf32>
    %c112 = arith.constant 112 : index
    %c0_43 = arith.constant 0 : index
    %237 = vector.load %arg10[%c112, %c0_43] : memref<248x128xf32, #tpu.memory_space<vmem>>, vector<8x128xf32>
    %cst_44 = arith.constant dense<0.000000e+00> : vector<8x128xf32>
    %238 = tpu.matmul %236, %7, %cst_44 {dimension_numbers = #tpu.dot_dimension_numbers<[1], [0], [0], [1], [0, 0, 1, 1], [], []>} : vector<8x32xf32>, vector<32x128xf32>, vector<8x128xf32> -> vector<8x128xf32>
    %239 = arith.addf %237, %238 : vector<8x128xf32>
    %240 = arith.mulf %239, %10 : vector<8x128xf32>
    %241 = math.tanh %240 : vector<8x128xf32>
    %242 = arith.mulf %241, %10 : vector<8x128xf32>
    %243 = arith.addf %242, %13 : vector<8x128xf32>
    %244 = vector.extract_strided_slice %243 {offsets = [0, 0], sizes = [8, 32], strides = [1, 1]} : vector<8x128xf32> to vector<8x32xf32>
    %245 = vector.extract_strided_slice %243 {offsets = [0, 32], sizes = [8, 32], strides = [1, 1]} : vector<8x128xf32> to vector<8x32xf32>
    %246 = vector.extract_strided_slice %243 {offsets = [0, 64], sizes = [8, 32], strides = [1, 1]} : vector<8x128xf32> to vector<8x32xf32>
    %247 = vector.extract_strided_slice %243 {offsets = [0, 96], sizes = [8, 32], strides = [1, 1]} : vector<8x128xf32> to vector<8x32xf32>
    %248 = arith.mulf %245, %234 : vector<8x32xf32>
    %249 = arith.mulf %244, %246 : vector<8x32xf32>
    %250 = arith.addf %248, %249 : vector<8x32xf32>
    %251 = math.tanh %250 : vector<8x32xf32>
    %252 = arith.mulf %247, %251 : vector<8x32xf32>
    %c120 = arith.constant 120 : index
    %c0_45 = arith.constant 0 : index
    %253 = vector.load %arg10[%c120, %c0_45] : memref<248x128xf32, #tpu.memory_space<vmem>>, vector<8x128xf32>
    %cst_46 = arith.constant dense<0.000000e+00> : vector<8x128xf32>
    %254 = tpu.matmul %252, %7, %cst_46 {dimension_numbers = #tpu.dot_dimension_numbers<[1], [0], [0], [1], [0, 0, 1, 1], [], []>} : vector<8x32xf32>, vector<32x128xf32>, vector<8x128xf32> -> vector<8x128xf32>
    %255 = arith.addf %253, %254 : vector<8x128xf32>
    %256 = arith.mulf %255, %10 : vector<8x128xf32>
    %257 = math.tanh %256 : vector<8x128xf32>
    %258 = arith.mulf %257, %10 : vector<8x128xf32>
    %259 = arith.addf %258, %13 : vector<8x128xf32>
    %260 = vector.extract_strided_slice %259 {offsets = [0, 0], sizes = [8, 32], strides = [1, 1]} : vector<8x128xf32> to vector<8x32xf32>
    %261 = vector.extract_strided_slice %259 {offsets = [0, 32], sizes = [8, 32], strides = [1, 1]} : vector<8x128xf32> to vector<8x32xf32>
    %262 = vector.extract_strided_slice %259 {offsets = [0, 64], sizes = [8, 32], strides = [1, 1]} : vector<8x128xf32> to vector<8x32xf32>
    %263 = vector.extract_strided_slice %259 {offsets = [0, 96], sizes = [8, 32], strides = [1, 1]} : vector<8x128xf32> to vector<8x32xf32>
    %264 = arith.mulf %261, %250 : vector<8x32xf32>
    %265 = arith.mulf %260, %262 : vector<8x32xf32>
    %266 = arith.addf %264, %265 : vector<8x32xf32>
    %267 = math.tanh %266 : vector<8x32xf32>
    %268 = arith.mulf %263, %267 : vector<8x32xf32>
    %c128 = arith.constant 128 : index
    %c0_47 = arith.constant 0 : index
    %269 = vector.load %arg10[%c128, %c0_47] : memref<248x128xf32, #tpu.memory_space<vmem>>, vector<8x128xf32>
    %cst_48 = arith.constant dense<0.000000e+00> : vector<8x128xf32>
    %270 = tpu.matmul %268, %7, %cst_48 {dimension_numbers = #tpu.dot_dimension_numbers<[1], [0], [0], [1], [0, 0, 1, 1], [], []>} : vector<8x32xf32>, vector<32x128xf32>, vector<8x128xf32> -> vector<8x128xf32>
    %271 = arith.addf %269, %270 : vector<8x128xf32>
    %272 = arith.mulf %271, %10 : vector<8x128xf32>
    %273 = math.tanh %272 : vector<8x128xf32>
    %274 = arith.mulf %273, %10 : vector<8x128xf32>
    %275 = arith.addf %274, %13 : vector<8x128xf32>
    %276 = vector.extract_strided_slice %275 {offsets = [0, 0], sizes = [8, 32], strides = [1, 1]} : vector<8x128xf32> to vector<8x32xf32>
    %277 = vector.extract_strided_slice %275 {offsets = [0, 32], sizes = [8, 32], strides = [1, 1]} : vector<8x128xf32> to vector<8x32xf32>
    %278 = vector.extract_strided_slice %275 {offsets = [0, 64], sizes = [8, 32], strides = [1, 1]} : vector<8x128xf32> to vector<8x32xf32>
    %279 = vector.extract_strided_slice %275 {offsets = [0, 96], sizes = [8, 32], strides = [1, 1]} : vector<8x128xf32> to vector<8x32xf32>
    %280 = arith.mulf %277, %266 : vector<8x32xf32>
    %281 = arith.mulf %276, %278 : vector<8x32xf32>
    %282 = arith.addf %280, %281 : vector<8x32xf32>
    %283 = math.tanh %282 : vector<8x32xf32>
    %284 = arith.mulf %279, %283 : vector<8x32xf32>
    %c136 = arith.constant 136 : index
    %c0_49 = arith.constant 0 : index
    %285 = vector.load %arg10[%c136, %c0_49] : memref<248x128xf32, #tpu.memory_space<vmem>>, vector<8x128xf32>
    %cst_50 = arith.constant dense<0.000000e+00> : vector<8x128xf32>
    %286 = tpu.matmul %284, %7, %cst_50 {dimension_numbers = #tpu.dot_dimension_numbers<[1], [0], [0], [1], [0, 0, 1, 1], [], []>} : vector<8x32xf32>, vector<32x128xf32>, vector<8x128xf32> -> vector<8x128xf32>
    %287 = arith.addf %285, %286 : vector<8x128xf32>
    %288 = arith.mulf %287, %10 : vector<8x128xf32>
    %289 = math.tanh %288 : vector<8x128xf32>
    %290 = arith.mulf %289, %10 : vector<8x128xf32>
    %291 = arith.addf %290, %13 : vector<8x128xf32>
    %292 = vector.extract_strided_slice %291 {offsets = [0, 0], sizes = [8, 32], strides = [1, 1]} : vector<8x128xf32> to vector<8x32xf32>
    %293 = vector.extract_strided_slice %291 {offsets = [0, 32], sizes = [8, 32], strides = [1, 1]} : vector<8x128xf32> to vector<8x32xf32>
    %294 = vector.extract_strided_slice %291 {offsets = [0, 64], sizes = [8, 32], strides = [1, 1]} : vector<8x128xf32> to vector<8x32xf32>
    %295 = vector.extract_strided_slice %291 {offsets = [0, 96], sizes = [8, 32], strides = [1, 1]} : vector<8x128xf32> to vector<8x32xf32>
    %296 = arith.mulf %293, %282 : vector<8x32xf32>
    %297 = arith.mulf %292, %294 : vector<8x32xf32>
    %298 = arith.addf %296, %297 : vector<8x32xf32>
    %299 = math.tanh %298 : vector<8x32xf32>
    %300 = arith.mulf %295, %299 : vector<8x32xf32>
    %c144 = arith.constant 144 : index
    %c0_51 = arith.constant 0 : index
    %301 = vector.load %arg10[%c144, %c0_51] : memref<248x128xf32, #tpu.memory_space<vmem>>, vector<8x128xf32>
    %cst_52 = arith.constant dense<0.000000e+00> : vector<8x128xf32>
    %302 = tpu.matmul %300, %7, %cst_52 {dimension_numbers = #tpu.dot_dimension_numbers<[1], [0], [0], [1], [0, 0, 1, 1], [], []>} : vector<8x32xf32>, vector<32x128xf32>, vector<8x128xf32> -> vector<8x128xf32>
    %303 = arith.addf %301, %302 : vector<8x128xf32>
    %304 = arith.mulf %303, %10 : vector<8x128xf32>
    %305 = math.tanh %304 : vector<8x128xf32>
    %306 = arith.mulf %305, %10 : vector<8x128xf32>
    %307 = arith.addf %306, %13 : vector<8x128xf32>
    %308 = vector.extract_strided_slice %307 {offsets = [0, 0], sizes = [8, 32], strides = [1, 1]} : vector<8x128xf32> to vector<8x32xf32>
    %309 = vector.extract_strided_slice %307 {offsets = [0, 32], sizes = [8, 32], strides = [1, 1]} : vector<8x128xf32> to vector<8x32xf32>
    %310 = vector.extract_strided_slice %307 {offsets = [0, 64], sizes = [8, 32], strides = [1, 1]} : vector<8x128xf32> to vector<8x32xf32>
    %311 = vector.extract_strided_slice %307 {offsets = [0, 96], sizes = [8, 32], strides = [1, 1]} : vector<8x128xf32> to vector<8x32xf32>
    %312 = arith.mulf %309, %298 : vector<8x32xf32>
    %313 = arith.mulf %308, %310 : vector<8x32xf32>
    %314 = arith.addf %312, %313 : vector<8x32xf32>
    %315 = math.tanh %314 : vector<8x32xf32>
    %316 = arith.mulf %311, %315 : vector<8x32xf32>
    %c152 = arith.constant 152 : index
    %c0_53 = arith.constant 0 : index
    %317 = vector.load %arg10[%c152, %c0_53] : memref<248x128xf32, #tpu.memory_space<vmem>>, vector<8x128xf32>
    %cst_54 = arith.constant dense<0.000000e+00> : vector<8x128xf32>
    %318 = tpu.matmul %316, %7, %cst_54 {dimension_numbers = #tpu.dot_dimension_numbers<[1], [0], [0], [1], [0, 0, 1, 1], [], []>} : vector<8x32xf32>, vector<32x128xf32>, vector<8x128xf32> -> vector<8x128xf32>
    %319 = arith.addf %317, %318 : vector<8x128xf32>
    %320 = arith.mulf %319, %10 : vector<8x128xf32>
    %321 = math.tanh %320 : vector<8x128xf32>
    %322 = arith.mulf %321, %10 : vector<8x128xf32>
    %323 = arith.addf %322, %13 : vector<8x128xf32>
    %324 = vector.extract_strided_slice %323 {offsets = [0, 0], sizes = [8, 32], strides = [1, 1]} : vector<8x128xf32> to vector<8x32xf32>
    %325 = vector.extract_strided_slice %323 {offsets = [0, 32], sizes = [8, 32], strides = [1, 1]} : vector<8x128xf32> to vector<8x32xf32>
    %326 = vector.extract_strided_slice %323 {offsets = [0, 64], sizes = [8, 32], strides = [1, 1]} : vector<8x128xf32> to vector<8x32xf32>
    %327 = vector.extract_strided_slice %323 {offsets = [0, 96], sizes = [8, 32], strides = [1, 1]} : vector<8x128xf32> to vector<8x32xf32>
    %328 = arith.mulf %325, %314 : vector<8x32xf32>
    %329 = arith.mulf %324, %326 : vector<8x32xf32>
    %330 = arith.addf %328, %329 : vector<8x32xf32>
    %331 = math.tanh %330 : vector<8x32xf32>
    %332 = arith.mulf %327, %331 : vector<8x32xf32>
    %c160 = arith.constant 160 : index
    %c0_55 = arith.constant 0 : index
    %333 = vector.load %arg10[%c160, %c0_55] : memref<248x128xf32, #tpu.memory_space<vmem>>, vector<8x128xf32>
    %cst_56 = arith.constant dense<0.000000e+00> : vector<8x128xf32>
    %334 = tpu.matmul %332, %7, %cst_56 {dimension_numbers = #tpu.dot_dimension_numbers<[1], [0], [0], [1], [0, 0, 1, 1], [], []>} : vector<8x32xf32>, vector<32x128xf32>, vector<8x128xf32> -> vector<8x128xf32>
    %335 = arith.addf %333, %334 : vector<8x128xf32>
    %336 = arith.mulf %335, %10 : vector<8x128xf32>
    %337 = math.tanh %336 : vector<8x128xf32>
    %338 = arith.mulf %337, %10 : vector<8x128xf32>
    %339 = arith.addf %338, %13 : vector<8x128xf32>
    %340 = vector.extract_strided_slice %339 {offsets = [0, 0], sizes = [8, 32], strides = [1, 1]} : vector<8x128xf32> to vector<8x32xf32>
    %341 = vector.extract_strided_slice %339 {offsets = [0, 32], sizes = [8, 32], strides = [1, 1]} : vector<8x128xf32> to vector<8x32xf32>
    %342 = vector.extract_strided_slice %339 {offsets = [0, 64], sizes = [8, 32], strides = [1, 1]} : vector<8x128xf32> to vector<8x32xf32>
    %343 = vector.extract_strided_slice %339 {offsets = [0, 96], sizes = [8, 32], strides = [1, 1]} : vector<8x128xf32> to vector<8x32xf32>
    %344 = arith.mulf %341, %330 : vector<8x32xf32>
    %345 = arith.mulf %340, %342 : vector<8x32xf32>
    %346 = arith.addf %344, %345 : vector<8x32xf32>
    %347 = math.tanh %346 : vector<8x32xf32>
    %348 = arith.mulf %343, %347 : vector<8x32xf32>
    %c168 = arith.constant 168 : index
    %c0_57 = arith.constant 0 : index
    %349 = vector.load %arg10[%c168, %c0_57] : memref<248x128xf32, #tpu.memory_space<vmem>>, vector<8x128xf32>
    %cst_58 = arith.constant dense<0.000000e+00> : vector<8x128xf32>
    %350 = tpu.matmul %348, %7, %cst_58 {dimension_numbers = #tpu.dot_dimension_numbers<[1], [0], [0], [1], [0, 0, 1, 1], [], []>} : vector<8x32xf32>, vector<32x128xf32>, vector<8x128xf32> -> vector<8x128xf32>
    %351 = arith.addf %349, %350 : vector<8x128xf32>
    %352 = arith.mulf %351, %10 : vector<8x128xf32>
    %353 = math.tanh %352 : vector<8x128xf32>
    %354 = arith.mulf %353, %10 : vector<8x128xf32>
    %355 = arith.addf %354, %13 : vector<8x128xf32>
    %356 = vector.extract_strided_slice %355 {offsets = [0, 0], sizes = [8, 32], strides = [1, 1]} : vector<8x128xf32> to vector<8x32xf32>
    %357 = vector.extract_strided_slice %355 {offsets = [0, 32], sizes = [8, 32], strides = [1, 1]} : vector<8x128xf32> to vector<8x32xf32>
    %358 = vector.extract_strided_slice %355 {offsets = [0, 64], sizes = [8, 32], strides = [1, 1]} : vector<8x128xf32> to vector<8x32xf32>
    %359 = vector.extract_strided_slice %355 {offsets = [0, 96], sizes = [8, 32], strides = [1, 1]} : vector<8x128xf32> to vector<8x32xf32>
    %360 = arith.mulf %357, %346 : vector<8x32xf32>
    %361 = arith.mulf %356, %358 : vector<8x32xf32>
    %362 = arith.addf %360, %361 : vector<8x32xf32>
    %363 = math.tanh %362 : vector<8x32xf32>
    %364 = arith.mulf %359, %363 : vector<8x32xf32>
    %c176 = arith.constant 176 : index
    %c0_59 = arith.constant 0 : index
    %365 = vector.load %arg10[%c176, %c0_59] : memref<248x128xf32, #tpu.memory_space<vmem>>, vector<8x128xf32>
    %cst_60 = arith.constant dense<0.000000e+00> : vector<8x128xf32>
    %366 = tpu.matmul %364, %7, %cst_60 {dimension_numbers = #tpu.dot_dimension_numbers<[1], [0], [0], [1], [0, 0, 1, 1], [], []>} : vector<8x32xf32>, vector<32x128xf32>, vector<8x128xf32> -> vector<8x128xf32>
    %367 = arith.addf %365, %366 : vector<8x128xf32>
    %368 = arith.mulf %367, %10 : vector<8x128xf32>
    %369 = math.tanh %368 : vector<8x128xf32>
    %370 = arith.mulf %369, %10 : vector<8x128xf32>
    %371 = arith.addf %370, %13 : vector<8x128xf32>
    %372 = vector.extract_strided_slice %371 {offsets = [0, 0], sizes = [8, 32], strides = [1, 1]} : vector<8x128xf32> to vector<8x32xf32>
    %373 = vector.extract_strided_slice %371 {offsets = [0, 32], sizes = [8, 32], strides = [1, 1]} : vector<8x128xf32> to vector<8x32xf32>
    %374 = vector.extract_strided_slice %371 {offsets = [0, 64], sizes = [8, 32], strides = [1, 1]} : vector<8x128xf32> to vector<8x32xf32>
    %375 = vector.extract_strided_slice %371 {offsets = [0, 96], sizes = [8, 32], strides = [1, 1]} : vector<8x128xf32> to vector<8x32xf32>
    %376 = arith.mulf %373, %362 : vector<8x32xf32>
    %377 = arith.mulf %372, %374 : vector<8x32xf32>
    %378 = arith.addf %376, %377 : vector<8x32xf32>
    %379 = math.tanh %378 : vector<8x32xf32>
    %380 = arith.mulf %375, %379 : vector<8x32xf32>
    %c184 = arith.constant 184 : index
    %c0_61 = arith.constant 0 : index
    %381 = vector.load %arg10[%c184, %c0_61] : memref<248x128xf32, #tpu.memory_space<vmem>>, vector<8x128xf32>
    %cst_62 = arith.constant dense<0.000000e+00> : vector<8x128xf32>
    %382 = tpu.matmul %380, %7, %cst_62 {dimension_numbers = #tpu.dot_dimension_numbers<[1], [0], [0], [1], [0, 0, 1, 1], [], []>} : vector<8x32xf32>, vector<32x128xf32>, vector<8x128xf32> -> vector<8x128xf32>
    %383 = arith.addf %381, %382 : vector<8x128xf32>
    %384 = arith.mulf %383, %10 : vector<8x128xf32>
    %385 = math.tanh %384 : vector<8x128xf32>
    %386 = arith.mulf %385, %10 : vector<8x128xf32>
    %387 = arith.addf %386, %13 : vector<8x128xf32>
    %388 = vector.extract_strided_slice %387 {offsets = [0, 0], sizes = [8, 32], strides = [1, 1]} : vector<8x128xf32> to vector<8x32xf32>
    %389 = vector.extract_strided_slice %387 {offsets = [0, 32], sizes = [8, 32], strides = [1, 1]} : vector<8x128xf32> to vector<8x32xf32>
    %390 = vector.extract_strided_slice %387 {offsets = [0, 64], sizes = [8, 32], strides = [1, 1]} : vector<8x128xf32> to vector<8x32xf32>
    %391 = vector.extract_strided_slice %387 {offsets = [0, 96], sizes = [8, 32], strides = [1, 1]} : vector<8x128xf32> to vector<8x32xf32>
    %392 = arith.mulf %389, %378 : vector<8x32xf32>
    %393 = arith.mulf %388, %390 : vector<8x32xf32>
    %394 = arith.addf %392, %393 : vector<8x32xf32>
    %395 = math.tanh %394 : vector<8x32xf32>
    %396 = arith.mulf %391, %395 : vector<8x32xf32>
    %c192 = arith.constant 192 : index
    %c0_63 = arith.constant 0 : index
    %397 = vector.load %arg10[%c192, %c0_63] : memref<248x128xf32, #tpu.memory_space<vmem>>, vector<8x128xf32>
    %cst_64 = arith.constant dense<0.000000e+00> : vector<8x128xf32>
    %398 = tpu.matmul %396, %7, %cst_64 {dimension_numbers = #tpu.dot_dimension_numbers<[1], [0], [0], [1], [0, 0, 1, 1], [], []>} : vector<8x32xf32>, vector<32x128xf32>, vector<8x128xf32> -> vector<8x128xf32>
    %399 = arith.addf %397, %398 : vector<8x128xf32>
    %400 = arith.mulf %399, %10 : vector<8x128xf32>
    %401 = math.tanh %400 : vector<8x128xf32>
    %402 = arith.mulf %401, %10 : vector<8x128xf32>
    %403 = arith.addf %402, %13 : vector<8x128xf32>
    %404 = vector.extract_strided_slice %403 {offsets = [0, 0], sizes = [8, 32], strides = [1, 1]} : vector<8x128xf32> to vector<8x32xf32>
    %405 = vector.extract_strided_slice %403 {offsets = [0, 32], sizes = [8, 32], strides = [1, 1]} : vector<8x128xf32> to vector<8x32xf32>
    %406 = vector.extract_strided_slice %403 {offsets = [0, 64], sizes = [8, 32], strides = [1, 1]} : vector<8x128xf32> to vector<8x32xf32>
    %407 = vector.extract_strided_slice %403 {offsets = [0, 96], sizes = [8, 32], strides = [1, 1]} : vector<8x128xf32> to vector<8x32xf32>
    %408 = arith.mulf %405, %394 : vector<8x32xf32>
    %409 = arith.mulf %404, %406 : vector<8x32xf32>
    %410 = arith.addf %408, %409 : vector<8x32xf32>
    %411 = math.tanh %410 : vector<8x32xf32>
    %412 = arith.mulf %407, %411 : vector<8x32xf32>
    %c200 = arith.constant 200 : index
    %c0_65 = arith.constant 0 : index
    %413 = vector.load %arg10[%c200, %c0_65] : memref<248x128xf32, #tpu.memory_space<vmem>>, vector<8x128xf32>
    %cst_66 = arith.constant dense<0.000000e+00> : vector<8x128xf32>
    %414 = tpu.matmul %412, %7, %cst_66 {dimension_numbers = #tpu.dot_dimension_numbers<[1], [0], [0], [1], [0, 0, 1, 1], [], []>} : vector<8x32xf32>, vector<32x128xf32>, vector<8x128xf32> -> vector<8x128xf32>
    %415 = arith.addf %413, %414 : vector<8x128xf32>
    %416 = arith.mulf %415, %10 : vector<8x128xf32>
    %417 = math.tanh %416 : vector<8x128xf32>
    %418 = arith.mulf %417, %10 : vector<8x128xf32>
    %419 = arith.addf %418, %13 : vector<8x128xf32>
    %420 = vector.extract_strided_slice %419 {offsets = [0, 0], sizes = [8, 32], strides = [1, 1]} : vector<8x128xf32> to vector<8x32xf32>
    %421 = vector.extract_strided_slice %419 {offsets = [0, 32], sizes = [8, 32], strides = [1, 1]} : vector<8x128xf32> to vector<8x32xf32>
    %422 = vector.extract_strided_slice %419 {offsets = [0, 64], sizes = [8, 32], strides = [1, 1]} : vector<8x128xf32> to vector<8x32xf32>
    %423 = vector.extract_strided_slice %419 {offsets = [0, 96], sizes = [8, 32], strides = [1, 1]} : vector<8x128xf32> to vector<8x32xf32>
    %424 = arith.mulf %421, %410 : vector<8x32xf32>
    %425 = arith.mulf %420, %422 : vector<8x32xf32>
    %426 = arith.addf %424, %425 : vector<8x32xf32>
    %427 = math.tanh %426 : vector<8x32xf32>
    %428 = arith.mulf %423, %427 : vector<8x32xf32>
    %c208 = arith.constant 208 : index
    %c0_67 = arith.constant 0 : index
    %429 = vector.load %arg10[%c208, %c0_67] : memref<248x128xf32, #tpu.memory_space<vmem>>, vector<8x128xf32>
    %cst_68 = arith.constant dense<0.000000e+00> : vector<8x128xf32>
    %430 = tpu.matmul %428, %7, %cst_68 {dimension_numbers = #tpu.dot_dimension_numbers<[1], [0], [0], [1], [0, 0, 1, 1], [], []>} : vector<8x32xf32>, vector<32x128xf32>, vector<8x128xf32> -> vector<8x128xf32>
    %431 = arith.addf %429, %430 : vector<8x128xf32>
    %432 = arith.mulf %431, %10 : vector<8x128xf32>
    %433 = math.tanh %432 : vector<8x128xf32>
    %434 = arith.mulf %433, %10 : vector<8x128xf32>
    %435 = arith.addf %434, %13 : vector<8x128xf32>
    %436 = vector.extract_strided_slice %435 {offsets = [0, 0], sizes = [8, 32], strides = [1, 1]} : vector<8x128xf32> to vector<8x32xf32>
    %437 = vector.extract_strided_slice %435 {offsets = [0, 32], sizes = [8, 32], strides = [1, 1]} : vector<8x128xf32> to vector<8x32xf32>
    %438 = vector.extract_strided_slice %435 {offsets = [0, 64], sizes = [8, 32], strides = [1, 1]} : vector<8x128xf32> to vector<8x32xf32>
    %439 = vector.extract_strided_slice %435 {offsets = [0, 96], sizes = [8, 32], strides = [1, 1]} : vector<8x128xf32> to vector<8x32xf32>
    %440 = arith.mulf %437, %426 : vector<8x32xf32>
    %441 = arith.mulf %436, %438 : vector<8x32xf32>
    %442 = arith.addf %440, %441 : vector<8x32xf32>
    %443 = math.tanh %442 : vector<8x32xf32>
    %444 = arith.mulf %439, %443 : vector<8x32xf32>
    %c216 = arith.constant 216 : index
    %c0_69 = arith.constant 0 : index
    %445 = vector.load %arg10[%c216, %c0_69] : memref<248x128xf32, #tpu.memory_space<vmem>>, vector<8x128xf32>
    %cst_70 = arith.constant dense<0.000000e+00> : vector<8x128xf32>
    %446 = tpu.matmul %444, %7, %cst_70 {dimension_numbers = #tpu.dot_dimension_numbers<[1], [0], [0], [1], [0, 0, 1, 1], [], []>} : vector<8x32xf32>, vector<32x128xf32>, vector<8x128xf32> -> vector<8x128xf32>
    %447 = arith.addf %445, %446 : vector<8x128xf32>
    %448 = arith.mulf %447, %10 : vector<8x128xf32>
    %449 = math.tanh %448 : vector<8x128xf32>
    %450 = arith.mulf %449, %10 : vector<8x128xf32>
    %451 = arith.addf %450, %13 : vector<8x128xf32>
    %452 = vector.extract_strided_slice %451 {offsets = [0, 0], sizes = [8, 32], strides = [1, 1]} : vector<8x128xf32> to vector<8x32xf32>
    %453 = vector.extract_strided_slice %451 {offsets = [0, 32], sizes = [8, 32], strides = [1, 1]} : vector<8x128xf32> to vector<8x32xf32>
    %454 = vector.extract_strided_slice %451 {offsets = [0, 64], sizes = [8, 32], strides = [1, 1]} : vector<8x128xf32> to vector<8x32xf32>
    %455 = vector.extract_strided_slice %451 {offsets = [0, 96], sizes = [8, 32], strides = [1, 1]} : vector<8x128xf32> to vector<8x32xf32>
    %456 = arith.mulf %453, %442 : vector<8x32xf32>
    %457 = arith.mulf %452, %454 : vector<8x32xf32>
    %458 = arith.addf %456, %457 : vector<8x32xf32>
    %459 = math.tanh %458 : vector<8x32xf32>
    %460 = arith.mulf %455, %459 : vector<8x32xf32>
    %c224 = arith.constant 224 : index
    %c0_71 = arith.constant 0 : index
    %461 = vector.load %arg10[%c224, %c0_71] : memref<248x128xf32, #tpu.memory_space<vmem>>, vector<8x128xf32>
    %cst_72 = arith.constant dense<0.000000e+00> : vector<8x128xf32>
    %462 = tpu.matmul %460, %7, %cst_72 {dimension_numbers = #tpu.dot_dimension_numbers<[1], [0], [0], [1], [0, 0, 1, 1], [], []>} : vector<8x32xf32>, vector<32x128xf32>, vector<8x128xf32> -> vector<8x128xf32>
    %463 = arith.addf %461, %462 : vector<8x128xf32>
    %464 = arith.mulf %463, %10 : vector<8x128xf32>
    %465 = math.tanh %464 : vector<8x128xf32>
    %466 = arith.mulf %465, %10 : vector<8x128xf32>
    %467 = arith.addf %466, %13 : vector<8x128xf32>
    %468 = vector.extract_strided_slice %467 {offsets = [0, 0], sizes = [8, 32], strides = [1, 1]} : vector<8x128xf32> to vector<8x32xf32>
    %469 = vector.extract_strided_slice %467 {offsets = [0, 32], sizes = [8, 32], strides = [1, 1]} : vector<8x128xf32> to vector<8x32xf32>
    %470 = vector.extract_strided_slice %467 {offsets = [0, 64], sizes = [8, 32], strides = [1, 1]} : vector<8x128xf32> to vector<8x32xf32>
    %471 = vector.extract_strided_slice %467 {offsets = [0, 96], sizes = [8, 32], strides = [1, 1]} : vector<8x128xf32> to vector<8x32xf32>
    %472 = arith.mulf %469, %458 : vector<8x32xf32>
    %473 = arith.mulf %468, %470 : vector<8x32xf32>
    %474 = arith.addf %472, %473 : vector<8x32xf32>
    %475 = math.tanh %474 : vector<8x32xf32>
    %476 = arith.mulf %471, %475 : vector<8x32xf32>
    %c232 = arith.constant 232 : index
    %c0_73 = arith.constant 0 : index
    %477 = vector.load %arg10[%c232, %c0_73] : memref<248x128xf32, #tpu.memory_space<vmem>>, vector<8x128xf32>
    %cst_74 = arith.constant dense<0.000000e+00> : vector<8x128xf32>
    %478 = tpu.matmul %476, %7, %cst_74 {dimension_numbers = #tpu.dot_dimension_numbers<[1], [0], [0], [1], [0, 0, 1, 1], [], []>} : vector<8x32xf32>, vector<32x128xf32>, vector<8x128xf32> -> vector<8x128xf32>
    %479 = arith.addf %477, %478 : vector<8x128xf32>
    %480 = arith.mulf %479, %10 : vector<8x128xf32>
    %481 = math.tanh %480 : vector<8x128xf32>
    %482 = arith.mulf %481, %10 : vector<8x128xf32>
    %483 = arith.addf %482, %13 : vector<8x128xf32>
    %484 = vector.extract_strided_slice %483 {offsets = [0, 0], sizes = [8, 32], strides = [1, 1]} : vector<8x128xf32> to vector<8x32xf32>
    %485 = vector.extract_strided_slice %483 {offsets = [0, 32], sizes = [8, 32], strides = [1, 1]} : vector<8x128xf32> to vector<8x32xf32>
    %486 = vector.extract_strided_slice %483 {offsets = [0, 64], sizes = [8, 32], strides = [1, 1]} : vector<8x128xf32> to vector<8x32xf32>
    %487 = vector.extract_strided_slice %483 {offsets = [0, 96], sizes = [8, 32], strides = [1, 1]} : vector<8x128xf32> to vector<8x32xf32>
    %488 = arith.mulf %485, %474 : vector<8x32xf32>
    %489 = arith.mulf %484, %486 : vector<8x32xf32>
    %490 = arith.addf %488, %489 : vector<8x32xf32>
    %491 = math.tanh %490 : vector<8x32xf32>
    %492 = arith.mulf %487, %491 : vector<8x32xf32>
    %c240 = arith.constant 240 : index
    %c0_75 = arith.constant 0 : index
    %493 = vector.load %arg10[%c240, %c0_75] : memref<248x128xf32, #tpu.memory_space<vmem>>, vector<8x128xf32>
    %cst_76 = arith.constant dense<0.000000e+00> : vector<8x128xf32>
    %494 = tpu.matmul %492, %7, %cst_76 {dimension_numbers = #tpu.dot_dimension_numbers<[1], [0], [0], [1], [0, 0, 1, 1], [], []>} : vector<8x32xf32>, vector<32x128xf32>, vector<8x128xf32> -> vector<8x128xf32>
    %495 = arith.addf %493, %494 : vector<8x128xf32>
    %496 = arith.mulf %495, %10 : vector<8x128xf32>
    %497 = math.tanh %496 : vector<8x128xf32>
    %498 = arith.mulf %497, %10 : vector<8x128xf32>
    %499 = arith.addf %498, %13 : vector<8x128xf32>
    %500 = vector.extract_strided_slice %499 {offsets = [0, 0], sizes = [8, 32], strides = [1, 1]} : vector<8x128xf32> to vector<8x32xf32>
    %501 = vector.extract_strided_slice %499 {offsets = [0, 32], sizes = [8, 32], strides = [1, 1]} : vector<8x128xf32> to vector<8x32xf32>
    %502 = vector.extract_strided_slice %499 {offsets = [0, 64], sizes = [8, 32], strides = [1, 1]} : vector<8x128xf32> to vector<8x32xf32>
    %503 = vector.extract_strided_slice %499 {offsets = [0, 96], sizes = [8, 32], strides = [1, 1]} : vector<8x128xf32> to vector<8x32xf32>
    %504 = arith.mulf %501, %490 : vector<8x32xf32>
    %505 = arith.mulf %500, %502 : vector<8x32xf32>
    %506 = arith.addf %504, %505 : vector<8x32xf32>
    %507 = math.tanh %506 : vector<8x32xf32>
    %508 = arith.mulf %503, %507 : vector<8x32xf32>
    %c0_77 = arith.constant 0 : index
    %c0_78 = arith.constant 0 : index
    %509 = vector.load %arg7[%c0_77, %c0_78] : memref<32x16xf32, #tpu.memory_space<vmem>>, vector<32x16xf32>
    %cst_79 = arith.constant dense<0.000000e+00> : vector<8x16xf32>
    %510 = tpu.matmul %508, %509, %cst_79 {dimension_numbers = #tpu.dot_dimension_numbers<[1], [0], [0], [1], [0, 0, 1, 1], [], []>} : vector<8x32xf32>, vector<32x16xf32>, vector<8x16xf32> -> vector<8x16xf32>
    %c0_80 = arith.constant 0 : index
    %c0_81 = arith.constant 0 : index
    %511 = vector.load %arg8[%c0_80, %c0_81] : memref<1x16xf32, #tpu.memory_space<vmem>>, vector<1x16xf32>
    %512 = vector.broadcast %511 : vector<1x16xf32> to vector<8x16xf32>
    %513 = arith.addf %510, %512 : vector<8x16xf32>
    %c0_82 = arith.constant 0 : index
    %c0_83 = arith.constant 0 : index
    %514 = vector.load %arg9[%c0_82, %c0_83] : memref<8x16xf32, #tpu.memory_space<vmem>>, vector<8x16xf32>
    tpu.vector_store %arg9[%c0_82, %c0_83], %513 {strides = array<i32>} : memref<8x16xf32, #tpu.memory_space<vmem>>, vector<8x16xf32>,
    return
  }
}

</mosaic_0001>

<bundles_post_ra>
// kernel: tpu_custom_call.1
= control target key start
LH: loop header
LB: loop body
LE: loop exit
PB: predicated region body
PF: predicated region fallthrough
CT: control target
= control target key end

     0   :  { %vm166_vm0 = vcmask 1045504   ;;  %v4612_v2 = vmov 0.0   ;;  %vm4613_vm1 = vmmov 0   ;;  %vm72_vm2 = vcmask 48128   ;;  %s5471_s0 = inlined_call_operand.vmem [shape: f32[248,6], index: 0, kind: input, shape index: {}]   ;;  %s5472_s1 = inlined_call_operand.vmem [shape: f32[6,128], index: 1, kind: input, shape index: {}]   ;;  %s5473_s2 = inlined_call_operand.vmem [shape: f32[32,128], index: 2, kind: input, shape index: {}]   ;;  %s5474_s3 = inlined_call_operand.vmem [shape: f32[1,128], index: 3, kind: input, shape index: {}]   ;;  %s5475_s4 = inlined_call_operand.vmem [shape: f32[1,128], index: 4, kind: input, shape index: {}]   ;;  %s5476_s5 = inlined_call_operand.vmem [shape: f32[1,128], index: 5, kind: input, shape index: {}]   ;;  %s5477_s6 = inlined_call_operand.vmem [shape: f32[1,32], index: 6, kind: input, shape index: {}]   ;;  %s5478_s7 = inlined_call_operand.vmem [shape: f32[32,16], index: 7, kind: input, shape index: {}]   ;;  %s5479_s8 = inlined_call_operand.vmem [shape: f32[1,16], index: 8, kind: input, shape index: {}]   ;;  %s5480_s9 = inlined_call_operand.hbm [shape: f32[8,16], index: 9, kind: output, shape index: {}]  }
   0x1   :  { %v64_v0 = vld [vmem:[%s5472_s1] sm:$0x3f]  ;;  %3765 = vmatprep.subr.mxu1 %v4612_v2  ;;  %3767 = vmatprep.mubr.msk.f32.mxu1 %vm4613_vm1, %v4612_v2 }
   0x2   :  { %v33_v1 = vld [vmem:[%s5471_s0] sm:$0xff] }
   0x3   :  { %14 = vsyncpa [#allocation4], 0  ;;  %3766 = vmatpush3.msk.msra.mxu1 %vm166_vm0, %v64_v0  ;;  %3945 = vmatprep.mubr.msk.f32.mxu0 %vm4613_vm1, %v4612_v2  ;;  %v4686_v3 = vld [vmem:[%s5474_s3] ss:$0 sm:$0xff]  ;;  %s4614_s18 = smov 64   ;;  %v422_v14 = vld [vmem:[%s5473_s2 + $0x8] sm:$0xff] }
   0x4   :  { %3768 = vmatmul.mubr.msk.f32.vlgmr.msra.gmra.mrb[0].mxu1 %vm72_vm2, %v33_v1  ;;  %v4691_v5 = vld [vmem:[%s5475_s4] ss:$0 sm:$0xff]  ;;  %v34_v15 = vld [vmem:[%s5471_s0 + $0x8] sm:$0xff]  ;;  %v4615_v16 = vmov 0.0|0.0   ;;  %v35_v21 = vld [vmem:[%s5471_s0 + $0x10] sm:$0xff]  ;;  %s4617_s19 = smov 32  }
   0x5   :  { %3770 = vmatprep.mubr.msk.f32.mxu1 %vm4613_vm1, %v4612_v2  ;;  %v4698_v10 = vld [vmem:[%s5476_s5] ss:$0 sm:$0xff]  ;;  %4201 = vmatprep.subr.bf16.mxu1 %v4615_v16  ;;  %v36_v23 = vld [vmem:[%s5471_s0 + $0x18] sm:$0xff]  ;;  %v423_v25 = vld [vmem:[%s5473_s2 + $0x10] sm:$0xff]  ;;  %vm467_vm3 = vcmask 261120   ;;  %vm3494_vm4 = vcmask 130048  }
   0x6   :  { %v421_v13 = vld [vmem:[%s5473_s2] sm:$0xff]  ;;  %4243 = vmatprep.subr.bf16.mxu0 %v4615_v16  ;;  %v424_v26 = vld [vmem:[%s5473_s2 + $0x18] sm:$0xff]  ;;  %v38_v28 = vld [vmem:[%s5471_s0 + $0x28] sm:$0xff]  ;;  %s4616_s2 = smov 96  }
   0x7   :  { %v4716_v17 = vpack.c.bf16 %v422_v14, %v421_v13  ;;  %v3545_v18 = vld [vmem:[%s5477_s6] ss:$0 sm:$0xff]  ;;  %v4752_v27 = vpack.c.bf16 %v424_v26, %v423_v25  ;;  %v39_v30 = vld [vmem:[%s5471_s0 + $0x30] sm:$0xff]  ;;  %v40_v31 = vld [vmem:[%s5471_s0 + $0x38] sm:$0xff] }
   0x8   :  { %3771 = vmatmul.mubr.msk.f32.gmra.mrb[2].mxu1 %vm72_vm2, %v34_v15  ;;  %v37_v24 = vld [vmem:[%s5471_s0 + $0x20] sm:$0xff]  ;;  %v42_v33 = vld [vmem:[%s5471_s0 + $0x48] sm:$0xff]  ;;  %v43_v34 = vld [vmem:[%s5471_s0 + $0x50] sm:$0xff] }
   0x9   :  { %3773 = vmatprep.mubr.msk.f32.mxu1 %vm4613_vm1, %v4612_v2  ;;  %4203 = vmatpush3.bf16.msra.mxu1 %v4716_v17  ;;  %v41_v32 = vld [vmem:[%s5471_s0 + $0x40] sm:$0xff]  ;;  %v44_v35 = vld [vmem:[%s5471_s0 + $0x58] sm:$0xff]  ;;  %v46_v37 = vld [vmem:[%s5471_s0 + $0x68] sm:$0xff] }
   0xa   :  { %4245 = vmatpush3.bf16.msra.mxu0 %v4716_v17  ;;  %4204 = vmatprep.subr.bf16.mxu1 %v4615_v16  ;;  %v45_v36 = vld [vmem:[%s5471_s0 + $0x60] sm:$0xff]  ;;  %v47_v38 = vld [vmem:[%s5471_s0 + $0x70] sm:$0xff]  ;;  %v48_v39 = vld [vmem:[%s5471_s0 + $0x78] sm:$0xff] }
   0xb   :  { %4246 = vmatprep.subr.bf16.mxu0 %v4615_v16  ;;  %v49_v40 = vld [vmem:[%s5471_s0 + $0x80] sm:$0xff]  ;;  %v50_v41 = vld [vmem:[%s5471_s0 + $0x88] sm:$0xff]  ;;  %v51_v42 = vld [vmem:[%s5471_s0 + $0x90] sm:$0xff] }
   0xc   :  { %3774 = vmatmul.mubr.msk.f32.gmra.mrb[4].mxu1 %vm72_vm2, %v35_v21  ;;  %v52_v43 = vld [vmem:[%s5471_s0 + $0x98] sm:$0xff]  ;;  %v53_v44 = vld [vmem:[%s5471_s0 + $0xa0] sm:$0xff]  ;;  %v54_v45 = vld [vmem:[%s5471_s0 + $0xa8] sm:$0xff] }
   0xd   :  { %3776 = vmatprep.mubr.msk.f32.mxu1 %vm4613_vm1, %v4612_v2  ;;  %4206 = vmatpush3.bf16.msra.mxu1 %v4752_v27  ;;  %v55_v46 = vld [vmem:[%s5471_s0 + $0xb0] sm:$0xff]  ;;  %v56_v47 = vld [vmem:[%s5471_s0 + $0xb8] sm:$0xff]  ;;  %v57_v48 = vld [vmem:[%s5471_s0 + $0xc0] sm:$0xff] }
   0xe   :  { %4248 = vmatpush3.bf16.msra.mxu0 %v4752_v27  ;;  %4207 = vmatprep.subr.bf16.mxu1 %v4615_v16  ;;  %v58_v49 = vld [vmem:[%s5471_s0 + $0xc8] sm:$0xff]  ;;  %v59_v50 = vld [vmem:[%s5471_s0 + $0xd0] sm:$0xff]  ;;  %v60_v51 = vld [vmem:[%s5471_s0 + $0xd8] sm:$0xff] }
   0xf   :  { %4249 = vmatprep.subr.bf16.mxu0 %v4615_v16  ;;  %v61_v52 = vld [vmem:[%s5471_s0 + $0xe0] sm:$0xff]  ;;  %v62_v53 = vld [vmem:[%s5471_s0 + $0xe8] sm:$0xff]  ;;  %v63_v54 = vld [vmem:[%s5471_s0 + $0xf0] sm:$0xff] }
  0x10   :  { %3777 = vmatmul.mubr.msk.f32.gmra.mrb[6].mxu1 %vm72_vm2, %v36_v23 }
  0x11   :  { %3779 = vmatprep.mubr.msk.f32.mxu1 %vm4613_vm1, %v4612_v2 }
  0x14   :  { %3780 = vmatmul.mubr.msk.f32.gmra.mrb[8].mxu1 %vm72_vm2, %v37_v24 }
  0x15   :  { %3782 = vmatprep.mubr.msk.f32.mxu1 %vm4613_vm1, %v4612_v2 }
  0x18   :  { %3783 = vmatmul.mubr.msk.f32.gmra.mrb[10].mxu1 %vm72_vm2, %v38_v28 }
  0x19   :  { %3785 = vmatprep.mubr.msk.f32.mxu1 %vm4613_vm1, %v4612_v2 }
  0x1c   :  { %3786 = vmatmul.mubr.msk.f32.gmra.mrb[12].mxu1 %vm72_vm2, %v39_v30 }
  0x1d   :  { %3788 = vmatprep.mubr.msk.f32.mxu1 %vm4613_vm1, %v4612_v2 }
  0x20   :  { %3789 = vmatmul.mubr.msk.f32.gmra.mrb[14].mxu1 %vm72_vm2, %v40_v31 }
  0x21   :  { %3791 = vmatprep.mubr.msk.f32.mxu1 %vm4613_vm1, %v4612_v2 }
  0x24   :  { %3792 = vmatmul.mubr.msk.f32.gmra.mrb[16].mxu1 %vm72_vm2, %v41_v32 }
  0x25   :  { %3794 = vmatprep.mubr.msk.f32.mxu1 %vm4613_vm1, %v4612_v2 }
  0x28   :  { %3795 = vmatmul.mubr.msk.f32.gmra.mrb[18].mxu1 %vm72_vm2, %v42_v33 }
  0x29   :  { %3797 = vmatprep.mubr.msk.f32.mxu1 %vm4613_vm1, %v4612_v2 }
  0x2c   :  { %3798 = vmatmul.mubr.msk.f32.gmra.mrb[20].mxu1 %vm72_vm2, %v43_v34 }
  0x2d   :  { %3800 = vmatprep.mubr.msk.f32.mxu1 %vm4613_vm1, %v4612_v2 }
  0x30   :  { %3801 = vmatmul.mubr.msk.f32.gmra.mrb[22].mxu1 %vm72_vm2, %v44_v35 }
  0x31   :  { %3803 = vmatprep.mubr.msk.f32.mxu1 %vm4613_vm1, %v4612_v2 }
  0x34   :  { %3804 = vmatmul.mubr.msk.f32.gmra.mrb[24].mxu1 %vm72_vm2, %v45_v36 }
  0x35   :  { %3806 = vmatprep.mubr.msk.f32.mxu1 %vm4613_vm1, %v4612_v2 }
  0x38   :  { %3807 = vmatmul.mubr.msk.f32.gmra.mrb[26].mxu1 %vm72_vm2, %v46_v37 }
  0x39   :  { %3809 = vmatprep.mubr.msk.f32.mxu1 %vm4613_vm1, %v4612_v2 }
  0x3c   :  { %3810 = vmatmul.mubr.msk.f32.gmra.mrb[28].mxu1 %vm72_vm2, %v47_v38 }
  0x3d   :  { %3812 = vmatprep.mubr.msk.f32.mxu1 %vm4613_vm1, %v4612_v2 }
  0x40   :  { %3813 = vmatmul.mubr.msk.f32.gmra.mrb[30].mxu1 %vm72_vm2, %v48_v39 }
  0x41   :  { %3815 = vmatprep.mubr.msk.f32.mxu1 %vm4613_vm1, %v4612_v2 }
  0x44   :  { %3816 = vmatmul.mubr.msk.f32.gmra.mrb[32].mxu1 %vm72_vm2, %v49_v40 }
  0x45   :  { %3818 = vmatprep.mubr.msk.f32.mxu1 %vm4613_vm1, %v4612_v2 }
  0x48   :  { %3819 = vmatmul.mubr.msk.f32.gmra.mrb[34].mxu1 %vm72_vm2, %v50_v41 }
  0x49   :  { %3821 = vmatprep.mubr.msk.f32.mxu1 %vm4613_vm1, %v4612_v2 }
  0x4c   :  { %3822 = vmatmul.mubr.msk.f32.gmra.mrb[36].mxu1 %vm72_vm2, %v51_v42 }
  0x4d   :  { %3824 = vmatprep.mubr.msk.f32.mxu1 %vm4613_vm1, %v4612_v2 }
  0x50   :  { %3825 = vmatmul.mubr.msk.f32.gmra.mrb[38].mxu1 %vm72_vm2, %v52_v43 }
  0x51   :  { %3827 = vmatprep.mubr.msk.f32.mxu1 %vm4613_vm1, %v4612_v2 }
  0x54   :  { %3828 = vmatmul.mubr.msk.f32.gmra.mrb[40].mxu1 %vm72_vm2, %v53_v44 }
  0x55   :  { %3830 = vmatprep.mubr.msk.f32.mxu1 %vm4613_vm1, %v4612_v2 }
  0x58   :  { %3831 = vmatmul.mubr.msk.f32.gmra.mrb[42].mxu1 %vm72_vm2, %v54_v45 }
  0x59   :  { %3833 = vmatprep.mubr.msk.f32.mxu1 %vm4613_vm1, %v4612_v2 }
  0x5c   :  { %3834 = vmatmul.mubr.msk.f32.gmra.mrb[44].mxu1 %vm72_vm2, %v55_v46 }
  0x5d   :  { %3836 = vmatprep.mubr.msk.f32.mxu1 %vm4613_vm1, %v4612_v2 }
  0x60   :  { %3837 = vmatmul.mubr.msk.f32.gmra.mrb[46].mxu1 %vm72_vm2, %v56_v47 }
  0x61   :  { %3839 = vmatprep.mubr.msk.f32.mxu1 %vm4613_vm1, %v4612_v2 }
  0x64   :  { %3840 = vmatmul.mubr.msk.f32.gmra.mrb[48].mxu1 %vm72_vm2, %v57_v48 }
  0x65   :  { %3842 = vmatprep.mubr.msk.f32.mxu1 %vm4613_vm1, %v4612_v2 }
  0x68   :  { %3843 = vmatmul.mubr.msk.f32.gmra.mrb[50].mxu1 %vm72_vm2, %v58_v49 }
  0x69   :  { %3845 = vmatprep.mubr.msk.f32.mxu1 %vm4613_vm1, %v4612_v2 }
  0x6c   :  { %3846 = vmatmul.mubr.msk.f32.gmra.mrb[52].mxu1 %vm72_vm2, %v59_v50 }
  0x6d   :  { %3848 = vmatprep.mubr.msk.f32.mxu1 %vm4613_vm1, %v4612_v2 }
  0x70   :  { %3849 = vmatmul.mubr.msk.f32.gmra.mrb[54].mxu1 %vm72_vm2, %v60_v51 }
  0x71   :  { %3851 = vmatprep.mubr.msk.f32.mxu1 %vm4613_vm1, %v4612_v2 }
  0x74   :  { %3852 = vmatmul.mubr.msk.f32.gmra.mrb[56].mxu1 %vm72_vm2, %v61_v52 }
  0x75   :  { %3854 = vmatprep.mubr.msk.f32.mxu1 %vm4613_vm1, %v4612_v2 }
  0x78   :  { %3855 = vmatmul.mubr.msk.f32.gmra.mrb[58].mxu1 %vm72_vm2, %v62_v53 }
  0x79   :  { %3857 = vmatprep.mubr.msk.f32.mxu1 %vm4613_vm1, %v4612_v2 }
  0x7c   :  { %3858 = vmatmul.mubr.msk.f32.gmra.mrb[60].mxu1 %vm72_vm2, %v63_v54 }
  0x7d   :  { %3868 = vmatprep.mubr.msk.f32.mxu1 %vm4613_vm1, %v4612_v2 }
  0xd7   :  { %v236_v4 = vpop.f32.mrb[0].mxu1 }
  0xd8   :  { %v237_v6 = vadd.f32 %v4686_v3, %v236_v4  ;;  %v3769_v7 = vpop.f32.mrb[1].mxu1 }
  0xda   :  { %v447_v8 = vmul.f32 %v4691_v5, %v237_v6 }
  0xdc   :  { %4461 = vtanh.f32 %v447_v8 }
  0xe6   :  { %v4462_v9 = vpop.eup %4461 }
  0xe7   :  { %v449_v11 = vmul.f32 %v4462_v9, %v4691_v5 }
  0xe9   :  { %v4702_v12 = vadd.f32 %v4698_v10, %v449_v11 }
  0xeb   :  { %452 = vrot.lane.b32.xlu0 %v4702_v12, %s4614_s18 }
  0xf7   :  { %v4919_v57 = vpop.f32.mrb[16].mxu1 }
  0xf8   :  { %v3793_v58 = vpop.f32.mrb[17].mxu1 }
  0xfb   :  { %v4921_v59 = vpop.f32.mrb[18].mxu1 }
  0xfc   :  { %v3796_v60 = vpop.f32.mrb[19].mxu1 }
  0xff   :  { %v4923_v61 = vpop.f32.mrb[20].mxu1 }
 0x100   :  { %v3799_v63 = vpop.f32.mrb[21].mxu1 }
 0x103   :  { %v4929_v0 = vpop.f32.mrb[22].mxu1 }
 0x104   :  { %v3802_v1 = vpop.f32.mrb[23].mxu1 }
 0x107   :  { %v4933_v4 = vpop.f32.mrb[24].mxu1 }
 0x108   :  { %v3805_v6 = vpop.f32.mrb[25].mxu1 }
 0x10b   :  { %v4936_v7 = vpop.f32.mrb[26].mxu1 }
 0x10c   :  { %v3808_v8 = vpop.f32.mrb[27].mxu1 }
 0x10f   :  { %v4938_v9 = vpop.f32.mrb[28].mxu1 }
 0x110   :  { %v3811_v11 = vpop.f32.mrb[29].mxu1 }
 0x15d   :  { %v453_v19 = vpop.permute.xlu0 %452 }
 0x15e   :  { %v455_v20 = vmul.f32 %v453_v19, %v4702_v12 }
 0x160   :  { %v456_v22 = vmul.f32 %v3545_v18, %v455_v20 }
 0x162   :  { %4463 = vtanh.f32 %v456_v22 }
 0x16c   :  { %v4464_v29 = vpop.eup %4463 }
 0x16d   :  { %459 = vrot.lane.b32.xlu0 %v4464_v29, %s4616_s2 }
 0x171   :  { %546 = vrot.lane.b32.xlu0 %v456_v22, %s4617_s19 }
 0x1df   :  { %v460_v55 = vpop.permute.xlu0 %459 }
 0x1e0   :  { %v462_v56 = vmul.f32 %v460_v55, %v4702_v12  ;;  %v4940_v12 = vpop.f32.mrb[30].mxu1 }
 0x1e1   :  { %v3814_v13 = vpop.f32.mrb[31].mxu1 }
 0x1e2   :  { %465 = vrot.lane.b32.xlu1 %v462_v56, %s4617_s19  ;;  %v4942_v14 = vpop.f32.mrb[32].mxu1 }
 0x1e3   :  { %v3817_v15 = vpop.f32.mrb[33].mxu1  ;;  %v547_v56 = vpop.permute.xlu0 %546 }
 0x1e4   :  { %v4944_v18 = vpop.f32.mrb[34].mxu1 }
 0x1e5   :  { %v3820_v19 = vpop.f32.mrb[35].mxu1 }
 0x1e6   :  { %v4946_v20 = vpop.f32.mrb[36].mxu1 }
 0x1e7   :  { %v3823_v21 = vpop.f32.mrb[37].mxu1 }
 0x1e8   :  { %v4948_v22 = vpop.f32.mrb[38].mxu1 }
 0x1e9   :  { %v3826_v23 = vpop.f32.mrb[39].mxu1 }
 0x1ea   :  { %v4950_v24 = vpop.f32.mrb[40].mxu1 }
 0x1eb   :  { %v3829_v25 = vpop.f32.mrb[41].mxu1 }
 0x1ec   :  { %v4952_v26 = vpop.f32.mrb[42].mxu1 }
 0x1ed   :  { %v3832_v28 = vpop.f32.mrb[43].mxu1 }
 0x1ee   :  { %v4954_v29 = vpop.f32.mrb[44].mxu1 }
 0x1ef   :  { %v3835_v30 = vpop.f32.mrb[45].mxu1 }
 0x1f0   :  { %v4956_v31 = vpop.f32.mrb[46].mxu1 }
 0x1f1   :  { %v3838_v32 = vpop.f32.mrb[47].mxu1 }
 0x1f2   :  { %v4958_v33 = vpop.f32.mrb[48].mxu1 }
 0x1f3   :  { %v3841_v34 = vpop.f32.mrb[49].mxu1 }
 0x1f4   :  { %v4960_v35 = vpop.f32.mrb[50].mxu1 }
 0x1f5   :  { %v3844_v36 = vpop.f32.mrb[51].mxu1 }
 0x1f6   :  { %v4962_v37 = vpop.f32.mrb[52].mxu1 }
 0x1f7   :  { %v3847_v38 = vpop.f32.mrb[53].mxu1 }
 0x1f8   :  { %v4964_v39 = vpop.f32.mrb[54].mxu1 }
 0x1f9   :  { %v3850_v40 = vpop.f32.mrb[55].mxu1 }
 0x1fa   :  { %v4966_v41 = vpop.f32.mrb[56].mxu1 }
 0x1fb   :  { %v3853_v42 = vpop.f32.mrb[57].mxu1 }
 0x1fc   :  { %v4968_v43 = vpop.f32.mrb[58].mxu1 }
 0x1fd   :  { %v3856_v44 = vpop.f32.mrb[59].mxu1 }
 0x1fe   :  { %v4970_v45 = vpop.f32.mrb[60].mxu1 }
 0x1ff   :  { %v3859_v46 = vpop.f32.mrb[61].mxu1 }
 0x254   :  { %v466_v62 = vpop.permute.xlu1 %465 }
 0x255   :  { %3869 = vmatmul.mubr.msk.f32.vlgmr.msra.gmra.mrb[2].mxu1 %vm467_vm3, %v466_v62 }
 0x256   :  { %4209 = vmatpush3.bf16.msra.mxu1 %v4716_v17  ;;  %3879 = vmatprep.mubr.msk.f32.mxu1 %vm4613_vm1, %v4612_v2 }
 0x257   :  { %4210 = vmatprep.subr.bf16.mxu1 %v4615_v16 }
 0x25a   :  { %4212 = vmatpush3.bf16.msra.mxu1 %v4752_v27 }
 0x25b   :  { %4213 = vmatprep.subr.bf16.mxu1 %v4615_v16 }
 0x328   :  { %v536_v47 = vpop.f32.mrb[2].mxu1 }
 0x329   :  { %v4387_v48 = vadd.f32 %v4686_v3, %v536_v47  ;;  %v3870_v49 = vpop.f32.mrb[3].mxu1 }
 0x32b   :  { %v541_v50 = vmul.f32 %v4387_v48, %v4691_v5 }
 0x32d   :  { %4465 = vtanh.f32 %v541_v50 }
 0x337   :  { %v4466_v51 = vpop.eup %4465 }
 0x338   :  { %v543_v52 = vmul.f32 %v4466_v51, %v4691_v5 }
 0x33a   :  { %v544_v53 = vadd.f32 %v4698_v10, %v543_v52 }
 0x33c   :  { %551 = vrot.lane.b32.xlu1 %v544_v53, %s4614_s18  ;;  %v549_v58 = vmul.f32 %v547_v56, %v544_v53 }
 0x3ae   :  { %v552_v54 = vpop.permute.xlu1 %551 }
 0x3af   :  { %v554_v55 = vmul.f32 %v552_v54, %v544_v53 }
 0x3b1   :  { %556 = vrot.lane.b32.xlu1 %v554_v55, %s4617_s19 }
 0x423   :  { %v557_v60 = vpop.permute.xlu1 %556 }
 0x424   :  { %v559_v62 = vadd.f32 %v557_v60, %v549_v58 }
 0x426   :  { %4467 = vtanh.f32 %v559_v62 }
 0x430   :  { %v4468_v63 = vpop.eup %4467 }
 0x431   :  { %562 = vrot.lane.b32.xlu0 %v4468_v63, %s4614_s18 }
 0x4a3   :  { %v563_v1 = vpop.permute.xlu0 %562 }
 0x4a4   :  { %v565_v6 = vmul.f32 %v563_v1, %v544_v53 }
 0x4a6   :  { %568 = vrot.lane.b32.xlu1 %v565_v6, %s4617_s19 }
 0x518   :  { %v569_v8 = vpop.permute.xlu1 %568 }
 0x519   :  { %3880 = vmatmul.mubr.msk.f32.vlgmr.msra.gmra.mrb[4].mxu1 %vm467_vm3, %v569_v8 }
 0x51a   :  { %4215 = vmatpush3.bf16.msra.mxu1 %v4716_v17  ;;  %3890 = vmatprep.mubr.msk.f32.mxu1 %vm4613_vm1, %v4612_v2 }
 0x51b   :  { %4216 = vmatprep.subr.bf16.mxu1 %v4615_v16 }
 0x51e   :  { %4218 = vmatpush3.bf16.msra.mxu1 %v4752_v27 }
 0x51f   :  { %4219 = vmatprep.subr.bf16.mxu1 %v4615_v16 }
 0x5ec   :  { %v638_v11 = vpop.f32.mrb[4].mxu1 }
 0x5ed   :  { %v4388_v13 = vadd.f32 %v4686_v3, %v638_v11  ;;  %v3881_v15 = vpop.f32.mrb[5].mxu1 }
 0x5ef   :  { %v643_v19 = vmul.f32 %v4388_v13, %v4691_v5 }
 0x5f1   :  { %4469 = vtanh.f32 %v643_v19 }
 0x5fb   :  { %v4470_v21 = vpop.eup %4469 }
 0x5fc   :  { %v645_v23 = vmul.f32 %v4470_v21, %v4691_v5 }
 0x5fe   :  { %v646_v25 = vadd.f32 %v4698_v10, %v645_v23 }
 0x600   :  { %649 = vrot.lane.b32.xlu0 %v646_v25, %s4614_s18  ;;  %v647_v32 = vmul.f32 %v646_v25, %v559_v62 }
 0x672   :  { %v650_v28 = vpop.permute.xlu0 %649 }
 0x673   :  { %v652_v30 = vmul.f32 %v650_v28, %v646_v25 }
 0x675   :  { %654 = vrot.lane.b32.xlu1 %v652_v30, %s4617_s19 }
 0x6e7   :  { %v655_v34 = vpop.permute.xlu1 %654 }
 0x6e8   :  { %v657_v36 = vadd.f32 %v655_v34, %v647_v32 }
 0x6ea   :  { %4471 = vtanh.f32 %v657_v36 }
 0x6f4   :  { %v4472_v38 = vpop.eup %4471 }
 0x6f5   :  { %660 = vrot.lane.b32.xlu0 %v4472_v38, %s4614_s18 }
 0x767   :  { %v661_v40 = vpop.permute.xlu0 %660 }
 0x768   :  { %v663_v42 = vmul.f32 %v661_v40, %v646_v25 }
 0x76a   :  { %666 = vrot.lane.b32.xlu1 %v663_v42, %s4617_s19 }
 0x7dc   :  { %v667_v44 = vpop.permute.xlu1 %666 }
 0x7dd   :  { %3891 = vmatmul.mubr.msk.f32.vlgmr.msra.gmra.mrb[6].mxu1 %vm467_vm3, %v667_v44 }
 0x7de   :  { %4221 = vmatpush3.bf16.msra.mxu1 %v4716_v17  ;;  %3901 = vmatprep.mubr.msk.f32.mxu1 %vm4613_vm1, %v4612_v2 }
 0x7df   :  { %4222 = vmatprep.subr.bf16.mxu1 %v4615_v16 }
 0x7e2   :  { %4224 = vmatpush3.bf16.msra.mxu1 %v4752_v27 }
 0x7e3   :  { %4225 = vmatprep.subr.bf16.mxu1 %v4615_v16 }
 0x8b0   :  { %v736_v46 = vpop.f32.mrb[6].mxu1 }
 0x8b1   :  { %v4389_v47 = vadd.f32 %v4686_v3, %v736_v46  ;;  %v3892_v48 = vpop.f32.mrb[7].mxu1 }
 0x8b3   :  { %v741_v49 = vmul.f32 %v4389_v47, %v4691_v5 }
 0x8b5   :  { %4473 = vtanh.f32 %v741_v49 }
 0x8bf   :  { %v4474_v50 = vpop.eup %4473 }
 0x8c0   :  { %v743_v51 = vmul.f32 %v4474_v50, %v4691_v5 }
 0x8c2   :  { %v744_v52 = vadd.f32 %v4698_v10, %v743_v51 }
 0x8c4   :  { %747 = vrot.lane.b32.xlu0 %v744_v52, %s4614_s18  ;;  %v745_v55 = vmul.f32 %v744_v52, %v657_v36 }
 0x936   :  { %v748_v53 = vpop.permute.xlu0 %747 }
 0x937   :  { %v750_v54 = vmul.f32 %v748_v53, %v744_v52 }
 0x939   :  { %752 = vrot.lane.b32.xlu1 %v750_v54, %s4617_s19 }
 0x9ab   :  { %v753_v56 = vpop.permute.xlu1 %752 }
 0x9ac   :  { %v755_v58 = vadd.f32 %v753_v56, %v745_v55 }
 0x9ae   :  { %4475 = vtanh.f32 %v755_v58 }
 0x9b8   :  { %v4476_v60 = vpop.eup %4475 }
 0x9b9   :  { %758 = vrot.lane.b32.xlu0 %v4476_v60, %s4614_s18 }
 0xa2b   :  { %v759_v62 = vpop.permute.xlu0 %758 }
 0xa2c   :  { %v761_v63 = vmul.f32 %v759_v62, %v744_v52 }
 0xa2e   :  { %764 = vrot.lane.b32.xlu1 %v761_v63, %s4617_s19 }
 0xaa0   :  { %v765_v1 = vpop.permute.xlu1 %764 }
 0xaa1   :  { %3902 = vmatmul.mubr.msk.f32.vlgmr.msra.gmra.mrb[8].mxu1 %vm467_vm3, %v765_v1 }
 0xaa2   :  { %4227 = vmatpush3.bf16.msra.mxu1 %v4716_v17  ;;  %3912 = vmatprep.mubr.msk.f32.mxu1 %vm4613_vm1, %v4612_v2 }
 0xaa3   :  { %4228 = vmatprep.subr.bf16.mxu1 %v4615_v16 }
 0xaa6   :  { %4230 = vmatpush3.bf16.msra.mxu1 %v4752_v27 }
 0xaa7   :  { %4231 = vmatprep.subr.bf16.mxu1 %v4615_v16 }
 0xb74   :  { %v834_v6 = vpop.f32.mrb[8].mxu1 }
 0xb75   :  { %v4390_v8 = vadd.f32 %v4686_v3, %v834_v6  ;;  %v3903_v11 = vpop.f32.mrb[9].mxu1 }
 0xb77   :  { %v839_v13 = vmul.f32 %v4390_v8, %v4691_v5 }
 0xb79   :  { %4477 = vtanh.f32 %v839_v13 }
 0xb83   :  { %v4478_v15 = vpop.eup %4477 }
 0xb84   :  { %v841_v19 = vmul.f32 %v4478_v15, %v4691_v5 }
 0xb86   :  { %v842_v21 = vadd.f32 %v4698_v10, %v841_v19 }
 0xb88   :  { %845 = vrot.lane.b32.xlu0 %v842_v21, %s4614_s18  ;;  %v843_v28 = vmul.f32 %v842_v21, %v755_v58 }
 0xbfa   :  { %v846_v23 = vpop.permute.xlu0 %845 }
 0xbfb   :  { %v848_v25 = vmul.f32 %v846_v23, %v842_v21 }
 0xbfd   :  { %850 = vrot.lane.b32.xlu1 %v848_v25, %s4617_s19 }
 0xc6f   :  { %v851_v30 = vpop.permute.xlu1 %850 }
 0xc70   :  { %v853_v32 = vadd.f32 %v851_v30, %v843_v28 }
 0xc72   :  { %4479 = vtanh.f32 %v853_v32 }
 0xc7c   :  { %v4480_v34 = vpop.eup %4479 }
 0xc7d   :  { %856 = vrot.lane.b32.xlu0 %v4480_v34, %s4614_s18 }
 0xcef   :  { %v857_v36 = vpop.permute.xlu0 %856 }
 0xcf0   :  { %v859_v38 = vmul.f32 %v857_v36, %v842_v21 }
 0xcf2   :  { %862 = vrot.lane.b32.xlu1 %v859_v38, %s4617_s19 }
 0xd64   :  { %v863_v40 = vpop.permute.xlu1 %862 }
 0xd65   :  { %3913 = vmatmul.mubr.msk.f32.vlgmr.msra.gmra.mrb[10].mxu1 %vm467_vm3, %v863_v40 }
 0xd66   :  { %4233 = vmatpush3.bf16.msra.mxu1 %v4716_v17  ;;  %3923 = vmatprep.mubr.msk.f32.mxu1 %vm4613_vm1, %v4612_v2 }
 0xd67   :  { %4234 = vmatprep.subr.bf16.mxu1 %v4615_v16 }
 0xd6a   :  { %4236 = vmatpush3.bf16.msra.mxu1 %v4752_v27 }
 0xd6b   :  { %4237 = vmatprep.subr.bf16.mxu1 %v4615_v16 }
 0xe38   :  { %v932_v42 = vpop.f32.mrb[10].mxu1 }
 0xe39   :  { %v4391_v44 = vadd.f32 %v4686_v3, %v932_v42  ;;  %v3914_v46 = vpop.f32.mrb[11].mxu1 }
 0xe3b   :  { %v937_v47 = vmul.f32 %v4391_v44, %v4691_v5 }
 0xe3d   :  { %4481 = vtanh.f32 %v937_v47 }
 0xe47   :  { %v4482_v48 = vpop.eup %4481 }
 0xe48   :  { %v939_v49 = vmul.f32 %v4482_v48, %v4691_v5 }
 0xe4a   :  { %v940_v50 = vadd.f32 %v4698_v10, %v939_v49 }
 0xe4c   :  { %943 = vrot.lane.b32.xlu0 %v940_v50, %s4614_s18  ;;  %v941_v53 = vmul.f32 %v940_v50, %v853_v32 }
 0xebe   :  { %v944_v51 = vpop.permute.xlu0 %943 }
 0xebf   :  { %v946_v52 = vmul.f32 %v944_v51, %v940_v50 }
 0xec1   :  { %948 = vrot.lane.b32.xlu1 %v946_v52, %s4617_s19 }
 0xf33   :  { %v949_v54 = vpop.permute.xlu1 %948 }
 0xf34   :  { %v951_v55 = vadd.f32 %v949_v54, %v941_v53 }
 0xf36   :  { %4483 = vtanh.f32 %v951_v55 }
 0xf40   :  { %v4484_v56 = vpop.eup %4483 }
 0xf41   :  { %954 = vrot.lane.b32.xlu0 %v4484_v56, %s4614_s18 }
 0xfb3   :  { %v955_v58 = vpop.permute.xlu0 %954 }
 0xfb4   :  { %v957_v60 = vmul.f32 %v955_v58, %v940_v50 }
 0xfb6   :  { %960 = vrot.lane.b32.xlu1 %v957_v60, %s4617_s19  ;;  %v277_v60 = vadd.f32 %v4686_v3, %v4919_v57 }
0x1028   :  { %v961_v62 = vpop.permute.xlu1 %960 }
0x1029   :  { %3924 = vmatmul.mubr.msk.f32.vlgmr.msra.gmra.mrb[12].mxu1 %vm467_vm3, %v961_v62 }
0x102a   :  { %4239 = vmatpush3.bf16.msra.mxu1 %v4716_v17  ;;  %3934 = vmatprep.mubr.msk.f32.mxu1 %vm4613_vm1, %v4612_v2 }
0x102b   :  { %4240 = vmatprep.subr.bf16.mxu1 %v4615_v16 }
0x102e   :  { %4242 = vmatpush3.bf16.msra.mxu1 %v4752_v27 }
0x102f   :  { %4381 = vmatprep.subr.bf16.mxu1 %v4615_v16 }
0x10fc   :  { %v1030_v63 = vpop.f32.mrb[12].mxu1 }
0x10fd   :  { %v4392_v1 = vadd.f32 %v4686_v3, %v1030_v63  ;;  %v3925_v6 = vpop.f32.mrb[13].mxu1 }
0x10ff   :  { %v1035_v8 = vmul.f32 %v4392_v1, %v4691_v5 }
0x1101   :  { %4485 = vtanh.f32 %v1035_v8 }
0x110b   :  { %v4486_v11 = vpop.eup %4485 }
0x110c   :  { %v1037_v13 = vmul.f32 %v4486_v11, %v4691_v5 }
0x110e   :  { %v1038_v15 = vadd.f32 %v4698_v10, %v1037_v13 }
0x1110   :  { %1041 = vrot.lane.b32.xlu0 %v1038_v15, %s4614_s18  ;;  %v1039_v23 = vmul.f32 %v1038_v15, %v951_v55 }
0x1182   :  { %v1042_v19 = vpop.permute.xlu0 %1041 }
0x1183   :  { %v1044_v21 = vmul.f32 %v1042_v19, %v1038_v15 }
0x1185   :  { %1046 = vrot.lane.b32.xlu1 %v1044_v21, %s4617_s19 }
0x11f7   :  { %v1047_v25 = vpop.permute.xlu1 %1046 }
0x11f8   :  { %v1049_v28 = vadd.f32 %v1047_v25, %v1039_v23 }
0x11fa   :  { %4487 = vtanh.f32 %v1049_v28 }
0x1204   :  { %v4488_v30 = vpop.eup %4487 }
0x1205   :  { %1052 = vrot.lane.b32.xlu0 %v4488_v30, %s4614_s18 }
0x1277   :  { %v1053_v32 = vpop.permute.xlu0 %1052 }
0x1278   :  { %v1055_v34 = vmul.f32 %v1053_v32, %v1038_v15 }
0x127a   :  { %1058 = vrot.lane.b32.xlu1 %v1055_v34, %s4617_s19  ;;  %v282_v34 = vadd.f32 %v4686_v3, %v4921_v59 }
0x12ec   :  { %v1059_v36 = vpop.permute.xlu1 %1058 }
0x12ed   :  { %3935 = vmatmul.mubr.msk.f32.vlgmr.msra.gmra.mrb[14].mxu1 %vm467_vm3, %v1059_v36 }
0x12ee   :  { %4198 = vmatprep.mubr.msk.f32.mxu1 %vm4613_vm1, %v4612_v2 }
0x13c0   :  { %v1128_v38 = vpop.f32.mrb[14].mxu1 }
0x13c1   :  { %v4393_v40 = vadd.f32 %v4686_v3, %v1128_v38  ;;  %v3936_v42 = vpop.f32.mrb[15].mxu1 }
0x13c3   :  { %v1133_v44 = vmul.f32 %v4393_v40, %v4691_v5 }
0x13c5   :  { %4489 = vtanh.f32 %v1133_v44 }
0x13cf   :  { %v4490_v46 = vpop.eup %4489 }
0x13d0   :  { %v1135_v47 = vmul.f32 %v4490_v46, %v4691_v5 }
0x13d2   :  { %v1136_v48 = vadd.f32 %v4698_v10, %v1135_v47 }
0x13d4   :  { %1139 = vrot.lane.b32.xlu0 %v1136_v48, %s4614_s18  ;;  %v1137_v51 = vmul.f32 %v1136_v48, %v1049_v28 }
0x1446   :  { %v1140_v49 = vpop.permute.xlu0 %1139 }
0x1447   :  { %v1142_v50 = vmul.f32 %v1140_v49, %v1136_v48 }
0x1449   :  { %1144 = vrot.lane.b32.xlu1 %v1142_v50, %s4617_s19 }
0x14bb   :  { %v1145_v52 = vpop.permute.xlu1 %1144 }
0x14bc   :  { %v1147_v53 = vadd.f32 %v1145_v52, %v1137_v51 }
0x14be   :  { %4491 = vtanh.f32 %v1147_v53 }
0x14c8   :  { %v4492_v54 = vpop.eup %4491 }
0x14c9   :  { %1150 = vrot.lane.b32.xlu0 %v4492_v54, %s4614_s18 }
0x153b   :  { %v1151_v55 = vpop.permute.xlu0 %1150 }
0x153c   :  { %v1153_v56 = vmul.f32 %v1151_v55, %v1136_v48 }
0x153e   :  { %1156 = vrot.lane.b32.xlu1 %v1153_v56, %s4617_s19  ;;  %v287_v56 = vadd.f32 %v4686_v3, %v4923_v61 }
0x15b0   :  { %v1157_v58 = vpop.permute.xlu1 %1156 }
0x15b1   :  { %3946 = vmatmul.mubr.msk.f32.vlgmr.msra.gmra.mrb[0].mxu0 %vm467_vm3, %v1157_v58 }
0x15b2   :  { %4251 = vmatpush3.bf16.msra.mxu0 %v4716_v17  ;;  %3956 = vmatprep.mubr.msk.f32.mxu0 %vm4613_vm1, %v4612_v2 }
0x15b3   :  { %4252 = vmatprep.subr.bf16.mxu0 %v4615_v16 }
0x15b6   :  { %4254 = vmatpush3.bf16.msra.mxu0 %v4752_v27 }
0x15b7   :  { %4255 = vmatprep.subr.bf16.mxu0 %v4615_v16 }
0x1684   :  { %v1226_v62 = vpop.f32.mrb[0].mxu0 }
0x1685   :  { %v1230_v63 = vadd.f32 %v1226_v62, %v277_v60  ;;  %v3947_v1 = vpop.f32.mrb[1].mxu0 }
0x1687   :  { %v1231_v6 = vmul.f32 %v4691_v5, %v1230_v63 }
0x1689   :  { %4493 = vtanh.f32 %v1231_v6 }
0x1693   :  { %v4494_v8 = vpop.eup %4493 }
0x1694   :  { %v1233_v11 = vmul.f32 %v4494_v8, %v4691_v5 }
0x1696   :  { %v1234_v13 = vadd.f32 %v4698_v10, %v1233_v11 }
0x1698   :  { %1237 = vrot.lane.b32.xlu0 %v1234_v13, %s4614_s18  ;;  %v1235_v21 = vmul.f32 %v1234_v13, %v1147_v53 }
0x170a   :  { %v1238_v15 = vpop.permute.xlu0 %1237 }
0x170b   :  { %v1240_v19 = vmul.f32 %v1238_v15, %v1234_v13 }
0x170d   :  { %1242 = vrot.lane.b32.xlu1 %v1240_v19, %s4617_s19 }
0x177f   :  { %v1243_v23 = vpop.permute.xlu1 %1242 }
0x1780   :  { %v1245_v57 = vadd.f32 %v1243_v23, %v1235_v21 }
0x1782   :  { %4495 = vtanh.f32 %v1245_v57 }
0x178c   :  { %v4496_v25 = vpop.eup %4495 }
0x178d   :  { %1248 = vrot.lane.b32.xlu0 %v4496_v25, %s4614_s18 }
0x17ff   :  { %v1249_v28 = vpop.permute.xlu0 %1248 }
0x1800   :  { %v1251_v30 = vmul.f32 %v1249_v28, %v1234_v13  ;;  %v292_v28 = vadd.f32 %v4686_v3, %v4929_v0 }
0x1802   :  { %1254 = vrot.lane.b32.xlu1 %v1251_v30, %s4617_s19 }
0x1874   :  { %v1255_v32 = vpop.permute.xlu1 %1254 }
0x1875   :  { %3957 = vmatmul.mubr.msk.f32.vlgmr.msra.gmra.mrb[2].mxu0 %vm467_vm3, %v1255_v32 }
0x1876   :  { %4257 = vmatpush3.bf16.msra.mxu0 %v4716_v17  ;;  %3967 = vmatprep.mubr.msk.f32.mxu0 %vm4613_vm1, %v4612_v2 }
0x1877   :  { %4258 = vmatprep.subr.bf16.mxu0 %v4615_v16 }
0x187a   :  { %4260 = vmatpush3.bf16.msra.mxu0 %v4752_v27 }
0x187b   :  { %4261 = vmatprep.subr.bf16.mxu0 %v4615_v16 }
0x1948   :  { %v1324_v36 = vpop.f32.mrb[2].mxu0 }
0x1949   :  { %v1328_v38 = vadd.f32 %v1324_v36, %v282_v34  ;;  %v3958_v40 = vpop.f32.mrb[3].mxu0 }
0x194b   :  { %v1329_v42 = vmul.f32 %v4691_v5, %v1328_v38 }
0x194d   :  { %4497 = vtanh.f32 %v1329_v42 }
0x1957   :  { %v4498_v44 = vpop.eup %4497 }
0x1958   :  { %v1331_v46 = vmul.f32 %v4498_v44, %v4691_v5 }
0x195a   :  { %v1332_v47 = vadd.f32 %v4698_v10, %v1331_v46 }
0x195c   :  { %1335 = vrot.lane.b32.xlu0 %v1332_v47, %s4614_s18  ;;  %v1333_v50 = vmul.f32 %v1332_v47, %v1245_v57 }
0x19ce   :  { %v1336_v48 = vpop.permute.xlu0 %1335 }
0x19cf   :  { %v1338_v49 = vmul.f32 %v1336_v48, %v1332_v47 }
0x19d1   :  { %1340 = vrot.lane.b32.xlu1 %v1338_v49, %s4617_s19 }
0x1a43   :  { %v1341_v51 = vpop.permute.xlu1 %1340 }
0x1a44   :  { %v1343_v59 = vadd.f32 %v1341_v51, %v1333_v50 }
0x1a46   :  { %4499 = vtanh.f32 %v1343_v59 }
0x1a50   :  { %v4500_v52 = vpop.eup %4499 }
0x1a51   :  { %1346 = vrot.lane.b32.xlu0 %v4500_v52, %s4614_s18  ;;  %v297_v52 = vadd.f32 %v4686_v3, %v4933_v4 }
0x1ac3   :  { %v1347_v53 = vpop.permute.xlu0 %1346 }
0x1ac4   :  { %v1349_v54 = vmul.f32 %v1347_v53, %v1332_v47 }
0x1ac6   :  { %1352 = vrot.lane.b32.xlu1 %v1349_v54, %s4617_s19 }
0x1b38   :  { %v1353_v55 = vpop.permute.xlu1 %1352 }
0x1b39   :  { %3968 = vmatmul.mubr.msk.f32.vlgmr.msra.gmra.mrb[4].mxu0 %vm467_vm3, %v1353_v55 }
0x1b3a   :  { %4263 = vmatpush3.bf16.msra.mxu0 %v4716_v17  ;;  %3978 = vmatprep.mubr.msk.f32.mxu0 %vm4613_vm1, %v4612_v2 }
0x1b3b   :  { %4264 = vmatprep.subr.bf16.mxu0 %v4615_v16 }
0x1b3e   :  { %4266 = vmatpush3.bf16.msra.mxu0 %v4752_v27 }
0x1b3f   :  { %4267 = vmatprep.subr.bf16.mxu0 %v4615_v16 }
0x1c0c   :  { %v1422_v58 = vpop.f32.mrb[4].mxu0 }
0x1c0d   :  { %v1426_v60 = vadd.f32 %v1422_v58, %v287_v56  ;;  %v3969_v62 = vpop.f32.mrb[5].mxu0 }
0x1c0f   :  { %v1427_v63 = vmul.f32 %v4691_v5, %v1426_v60 }
0x1c11   :  { %4501 = vtanh.f32 %v1427_v63 }
0x1c1b   :  { %v4502_v1 = vpop.eup %4501 }
0x1c1c   :  { %v1429_v6 = vmul.f32 %v4502_v1, %v4691_v5 }
0x1c1e   :  { %v1430_v8 = vadd.f32 %v4698_v10, %v1429_v6 }
0x1c20   :  { %1433 = vrot.lane.b32.xlu0 %v1430_v8, %s4614_s18  ;;  %v1431_v15 = vmul.f32 %v1430_v8, %v1343_v59 }
0x1c92   :  { %v1434_v11 = vpop.permute.xlu0 %1433 }
0x1c93   :  { %v1436_v13 = vmul.f32 %v1434_v11, %v1430_v8 }
0x1c95   :  { %1438 = vrot.lane.b32.xlu1 %v1436_v13, %s4617_s19 }
0x1d07   :  { %v1439_v19 = vpop.permute.xlu1 %1438 }
0x1d08   :  { %v1441_v61 = vadd.f32 %v1439_v19, %v1431_v15 }
0x1d0a   :  { %4503 = vtanh.f32 %v1441_v61 }
0x1d14   :  { %v4504_v21 = vpop.eup %4503 }
0x1d15   :  { %1444 = vrot.lane.b32.xlu0 %v4504_v21, %s4614_s18 }
0x1d87   :  { %v1445_v23 = vpop.permute.xlu0 %1444 }
0x1d88   :  { %v1447_v57 = vmul.f32 %v1445_v23, %v1430_v8  ;;  %v5163_v23 = vld [vmem:[%s5475_s4] ss:$0 sm:$0xff] }
0x1d8a   :  { %1450 = vrot.lane.b32.xlu1 %v1447_v57, %s4617_s19 }
0x1dfc   :  { %v1451_v25 = vpop.permute.xlu1 %1450 }
0x1dfd   :  { %3979 = vmatmul.mubr.msk.f32.vlgmr.msra.gmra.mrb[6].mxu0 %vm467_vm3, %v1451_v25 }
0x1dfe   :  { %4269 = vmatpush3.bf16.msra.mxu0 %v4716_v17  ;;  %3989 = vmatprep.mubr.msk.f32.mxu0 %vm4613_vm1, %v4612_v2 }
0x1dff   :  { %4270 = vmatprep.subr.bf16.mxu0 %v4615_v16 }
0x1e02   :  { %4272 = vmatpush3.bf16.msra.mxu0 %v4752_v27 }
0x1e03   :  { %4273 = vmatprep.subr.bf16.mxu0 %v4615_v16 }
0x1ed0   :  { %v1520_v30 = vpop.f32.mrb[6].mxu0 }
0x1ed1   :  { %v1524_v32 = vadd.f32 %v1520_v30, %v292_v28  ;;  %v3980_v34 = vpop.f32.mrb[7].mxu0  ;;  %v5170_v30 = vld [vmem:[%s5476_s5] ss:$0 sm:$0xff] }
0x1ed3   :  { %v1525_v36 = vmul.f32 %v4691_v5, %v1524_v32 }
0x1ed5   :  { %4505 = vtanh.f32 %v1525_v36 }
0x1edf   :  { %v4506_v38 = vpop.eup %4505 }
0x1ee0   :  { %v1527_v40 = vmul.f32 %v4506_v38, %v4691_v5 }
0x1ee2   :  { %v1528_v42 = vadd.f32 %v4698_v10, %v1527_v40 }
0x1ee4   :  { %1531 = vrot.lane.b32.xlu0 %v1528_v42, %s4614_s18  ;;  %v1529_v47 = vmul.f32 %v1528_v42, %v1441_v61 }
0x1f56   :  { %v1532_v44 = vpop.permute.xlu0 %1531 }
0x1f57   :  { %v1534_v46 = vmul.f32 %v1532_v44, %v1528_v42 }
0x1f59   :  { %1536 = vrot.lane.b32.xlu1 %v1534_v46, %s4617_s19 }
0x1fcb   :  { %v1537_v48 = vpop.permute.xlu1 %1536 }
0x1fcc   :  { %v1539_v0 = vadd.f32 %v1537_v48, %v1529_v47 }
0x1fce   :  { %4507 = vtanh.f32 %v1539_v0 }
0x1fd8   :  { %v4508_v49 = vpop.eup %4507 }
0x1fd9   :  { %1542 = vrot.lane.b32.xlu0 %v4508_v49, %s4614_s18 }
0x204b   :  { %v1543_v50 = vpop.permute.xlu0 %1542 }
0x204c   :  { %v1545_v51 = vmul.f32 %v1543_v50, %v1528_v42 }
0x204e   :  { %1548 = vrot.lane.b32.xlu1 %v1545_v51, %s4617_s19 }
0x20c0   :  { %v1549_v59 = vpop.permute.xlu1 %1548 }
0x20c1   :  { %3990 = vmatmul.mubr.msk.f32.vlgmr.msra.gmra.mrb[8].mxu0 %vm467_vm3, %v1549_v59 }
0x20c2   :  { %4275 = vmatpush3.bf16.msra.mxu0 %v4716_v17  ;;  %4000 = vmatprep.mubr.msk.f32.mxu0 %vm4613_vm1, %v4612_v2 }
0x20c3   :  { %4276 = vmatprep.subr.bf16.mxu0 %v4615_v16 }
0x20c6   :  { %4278 = vmatpush3.bf16.msra.mxu0 %v4752_v27 }
0x20c7   :  { %4279 = vmatprep.subr.bf16.mxu0 %v4615_v16 }
0x2194   :  { %v1618_v53 = vpop.f32.mrb[8].mxu0 }
0x2195   :  { %v1622_v54 = vadd.f32 %v1618_v53, %v297_v52  ;;  %v3991_v55 = vpop.f32.mrb[9].mxu0 }
0x2197   :  { %v1623_v56 = vmul.f32 %v4691_v5, %v1622_v54 }
0x2199   :  { %4509 = vtanh.f32 %v1623_v56 }
0x21a3   :  { %v4510_v58 = vpop.eup %4509 }
0x21a4   :  { %v1625_v60 = vmul.f32 %v4510_v58, %v4691_v5 }
0x21a6   :  { %v1626_v62 = vadd.f32 %v4698_v10, %v1625_v60  ;;  %v5156_v10 = vld [vmem:[%s5474_s3] ss:$0 sm:$0xff] }
0x21a7   :  { %v302_v15 = vadd.f32 %v5156_v10, %v4936_v7  ;;  %v307_v48 = vadd.f32 %v5156_v10, %v4938_v9 }
0x21a8   :  { %1629 = vrot.lane.b32.xlu0 %v1626_v62, %s4614_s18  ;;  %v1627_v6 = vmul.f32 %v1626_v62, %v1539_v0 }
0x221a   :  { %v1630_v63 = vpop.permute.xlu0 %1629 }
0x221b   :  { %v1632_v1 = vmul.f32 %v1630_v63, %v1626_v62 }
0x221d   :  { %1634 = vrot.lane.b32.xlu1 %v1632_v1, %s4617_s19 }
0x228f   :  { %v1635_v8 = vpop.permute.xlu1 %1634 }
0x2290   :  { %v1637_v3 = vadd.f32 %v1635_v8, %v1627_v6  ;;  %v312_v6 = vadd.f32 %v5156_v10, %v4940_v12 }
0x2292   :  { %4511 = vtanh.f32 %v1637_v3 }
0x229c   :  { %v4512_v4 = vpop.eup %4511 }
0x229d   :  { %1640 = vrot.lane.b32.xlu0 %v4512_v4, %s4614_s18 }
0x230f   :  { %v1641_v11 = vpop.permute.xlu0 %1640 }
0x2310   :  { %v1643_v13 = vmul.f32 %v1641_v11, %v1626_v62 }
0x2312   :  { %1646 = vrot.lane.b32.xlu1 %v1643_v13, %s4617_s19 }
0x2384   :  { %v1647_v5 = vpop.permute.xlu1 %1646 }
0x2385   :  { %4001 = vmatmul.mubr.msk.f32.vlgmr.msra.gmra.mrb[10].mxu0 %vm467_vm3, %v1647_v5 }
0x2386   :  { %4281 = vmatpush3.bf16.msra.mxu0 %v4716_v17  ;;  %4011 = vmatprep.mubr.msk.f32.mxu0 %vm4613_vm1, %v4612_v2 }
0x2387   :  { %4282 = vmatprep.subr.bf16.mxu0 %v4615_v16 }
0x238a   :  { %4284 = vmatpush3.bf16.msra.mxu0 %v4752_v27 }
0x238b   :  { %4285 = vmatprep.subr.bf16.mxu0 %v4615_v16 }
0x2458   :  { %v1716_v19 = vpop.f32.mrb[10].mxu0 }
0x2459   :  { %v1720_v61 = vadd.f32 %v1716_v19, %v302_v15  ;;  %v4002_v21 = vpop.f32.mrb[11].mxu0 }
0x245b   :  { %v1721_v57 = vmul.f32 %v5163_v23, %v1720_v61 }
0x245d   :  { %4513 = vtanh.f32 %v1721_v57 }
0x2467   :  { %v4514_v25 = vpop.eup %4513 }
0x2468   :  { %v1723_v28 = vmul.f32 %v5163_v23, %v4514_v25 }
0x246a   :  { %v1724_v7 = vadd.f32 %v5170_v30, %v1723_v28 }
0x246c   :  { %1727 = vrot.lane.b32.xlu0 %v1724_v7, %s4614_s18  ;;  %v1725_v36 = vmul.f32 %v1724_v7, %v1637_v3 }
0x24de   :  { %v1728_v32 = vpop.permute.xlu0 %1727 }
0x24df   :  { %v1730_v34 = vmul.f32 %v1728_v32, %v1724_v7 }
0x24e1   :  { %1732 = vrot.lane.b32.xlu1 %v1730_v34, %s4617_s19  ;;  %v317_v34 = vadd.f32 %v5156_v10, %v4942_v14 }
0x2553   :  { %v1733_v38 = vpop.permute.xlu1 %1732 }
0x2554   :  { %v1735_v40 = vadd.f32 %v1733_v38, %v1725_v36 }
0x2556   :  { %4515 = vtanh.f32 %v1735_v40 }
0x2560   :  { %v4516_v42 = vpop.eup %4515 }
0x2561   :  { %1738 = vrot.lane.b32.xlu0 %v4516_v42, %s4614_s18 }
0x25d3   :  { %v1739_v44 = vpop.permute.xlu0 %1738 }
0x25d4   :  { %v1741_v46 = vmul.f32 %v1739_v44, %v1724_v7 }
0x25d6   :  { %1744 = vrot.lane.b32.xlu1 %v1741_v46, %s4617_s19 }
0x2648   :  { %v1745_v47 = vpop.permute.xlu1 %1744 }
0x2649   :  { %4012 = vmatmul.mubr.msk.f32.vlgmr.msra.gmra.mrb[12].mxu0 %vm467_vm3, %v1745_v47 }
0x264a   :  { %4287 = vmatpush3.bf16.msra.mxu0 %v4716_v17  ;;  %4022 = vmatprep.mubr.msk.f32.mxu0 %vm4613_vm1, %v4612_v2 }
0x264b   :  { %4288 = vmatprep.subr.bf16.mxu0 %v4615_v16 }
0x264e   :  { %4290 = vmatpush3.bf16.msra.mxu0 %v4752_v27 }
0x264f   :  { %4291 = vmatprep.subr.bf16.mxu0 %v4615_v16 }
0x271c   :  { %v1814_v0 = vpop.f32.mrb[12].mxu0 }
0x271d   :  { %v1818_v49 = vadd.f32 %v1814_v0, %v307_v48  ;;  %v4013_v50 = vpop.f32.mrb[13].mxu0 }
0x271f   :  { %v1819_v51 = vmul.f32 %v5163_v23, %v1818_v49 }
0x2721   :  { %4517 = vtanh.f32 %v1819_v51 }
0x272b   :  { %v4518_v59 = vpop.eup %4517 }
0x272c   :  { %v1821_v52 = vmul.f32 %v5163_v23, %v4518_v59 }
0x272e   :  { %v1822_v53 = vadd.f32 %v5170_v30, %v1821_v52 }
0x2730   :  { %1825 = vrot.lane.b32.xlu0 %v1822_v53, %s4614_s18  ;;  %v1823_v56 = vmul.f32 %v1822_v53, %v1735_v40 }
0x27a2   :  { %v1826_v54 = vpop.permute.xlu0 %1825 }
0x27a3   :  { %v1828_v55 = vmul.f32 %v1826_v54, %v1822_v53  ;;  %v322_v54 = vadd.f32 %v5156_v10, %v4944_v18 }
0x27a5   :  { %1830 = vrot.lane.b32.xlu1 %v1828_v55, %s4617_s19 }
0x2817   :  { %v1831_v58 = vpop.permute.xlu1 %1830 }
0x2818   :  { %v1833_v9 = vadd.f32 %v1831_v58, %v1823_v56 }
0x281a   :  { %4519 = vtanh.f32 %v1833_v9 }
0x2824   :  { %v4520_v60 = vpop.eup %4519 }
0x2825   :  { %1836 = vrot.lane.b32.xlu0 %v4520_v60, %s4614_s18 }
0x2897   :  { %v1837_v62 = vpop.permute.xlu0 %1836 }
0x2898   :  { %v1839_v63 = vmul.f32 %v1837_v62, %v1822_v53 }
0x289a   :  { %1842 = vrot.lane.b32.xlu1 %v1839_v63, %s4617_s19 }
0x290c   :  { %v1843_v1 = vpop.permute.xlu1 %1842 }
0x290d   :  { %4023 = vmatmul.mubr.msk.f32.vlgmr.msra.gmra.mrb[14].mxu0 %vm467_vm3, %v1843_v1 }
0x290e   :  { %4293 = vmatpush3.bf16.msra.mxu0 %v4716_v17  ;;  %4033 = vmatprep.mubr.msk.f32.mxu0 %vm4613_vm1, %v4612_v2 }
0x290f   :  { %4294 = vmatprep.subr.bf16.mxu0 %v4615_v16 }
0x2912   :  { %4296 = vmatpush3.bf16.msra.mxu0 %v4752_v27 }
0x2913   :  { %4297 = vmatprep.subr.bf16.mxu0 %v4615_v16 }
0x29e0   :  { %v1912_v8 = vpop.f32.mrb[14].mxu0 }
0x29e1   :  { %v1916_v3 = vadd.f32 %v1912_v8, %v312_v6  ;;  %v4024_v4 = vpop.f32.mrb[15].mxu0 }
0x29e3   :  { %v1917_v11 = vmul.f32 %v5163_v23, %v1916_v3 }
0x29e5   :  { %4521 = vtanh.f32 %v1917_v11 }
0x29ef   :  { %v4522_v13 = vpop.eup %4521 }
0x29f0   :  { %v1919_v5 = vmul.f32 %v5163_v23, %v4522_v13 }
0x29f2   :  { %v1920_v15 = vadd.f32 %v5170_v30, %v1919_v5 }
0x29f4   :  { %1923 = vrot.lane.b32.xlu0 %v1920_v15, %s4614_s18  ;;  %v1921_v21 = vmul.f32 %v1920_v15, %v1833_v9 }
0x2a66   :  { %v1924_v19 = vpop.permute.xlu0 %1923 }
0x2a67   :  { %v1926_v61 = vmul.f32 %v1924_v19, %v1920_v15 }
0x2a69   :  { %1928 = vrot.lane.b32.xlu1 %v1926_v61, %s4617_s19 }
0x2adb   :  { %v1929_v57 = vpop.permute.xlu1 %1928 }
0x2adc   :  { %v1931_v12 = vadd.f32 %v1929_v57, %v1921_v21 }
0x2ade   :  { %4523 = vtanh.f32 %v1931_v12 }
0x2ae8   :  { %v4524_v25 = vpop.eup %4523 }
0x2ae9   :  { %1934 = vrot.lane.b32.xlu0 %v4524_v25, %s4614_s18 }
0x2b5b   :  { %v1935_v28 = vpop.permute.xlu0 %1934 }
0x2b5c   :  { %v1937_v7 = vmul.f32 %v1935_v28, %v1920_v15  ;;  %v327_v15 = vadd.f32 %v5156_v10, %v4946_v20 }
0x2b5e   :  { %1940 = vrot.lane.b32.xlu1 %v1937_v7, %s4617_s19 }
0x2bd0   :  { %v1941_v32 = vpop.permute.xlu1 %1940 }
0x2bd1   :  { %4034 = vmatmul.mubr.msk.f32.vlgmr.msra.gmra.mrb[16].mxu0 %vm467_vm3, %v1941_v32 }
0x2bd2   :  { %4299 = vmatpush3.bf16.msra.mxu0 %v4716_v17  ;;  %4044 = vmatprep.mubr.msk.f32.mxu0 %vm4613_vm1, %v4612_v2 }
0x2bd3   :  { %4300 = vmatprep.subr.bf16.mxu0 %v4615_v16 }
0x2bd6   :  { %4302 = vmatpush3.bf16.msra.mxu0 %v4752_v27 }
0x2bd7   :  { %4303 = vmatprep.subr.bf16.mxu0 %v4615_v16 }
0x2ca4   :  { %v2010_v36 = vpop.f32.mrb[16].mxu0 }
0x2ca5   :  { %v2014_v38 = vadd.f32 %v2010_v36, %v317_v34  ;;  %v4035_v40 = vpop.f32.mrb[17].mxu0 }
0x2ca7   :  { %v2015_v42 = vmul.f32 %v5163_v23, %v2014_v38 }
0x2ca9   :  { %4525 = vtanh.f32 %v2015_v42 }
0x2cb3   :  { %v4526_v44 = vpop.eup %4525 }
0x2cb4   :  { %v2017_v46 = vmul.f32 %v5163_v23, %v4526_v44 }
0x2cb6   :  { %v2018_v47 = vadd.f32 %v5170_v30, %v2017_v46  ;;  %v332_v46 = vadd.f32 %v5156_v10, %v4948_v22 }
0x2cb8   :  { %2021 = vrot.lane.b32.xlu0 %v2018_v47, %s4614_s18  ;;  %v2019_v49 = vmul.f32 %v2018_v47, %v1931_v12 }
0x2d2a   :  { %v2022_v48 = vpop.permute.xlu0 %2021 }
0x2d2b   :  { %v2024_v0 = vmul.f32 %v2022_v48, %v2018_v47 }
0x2d2d   :  { %2026 = vrot.lane.b32.xlu1 %v2024_v0, %s4617_s19 }
0x2d9f   :  { %v2027_v50 = vpop.permute.xlu1 %2026 }
0x2da0   :  { %v2029_v14 = vadd.f32 %v2027_v50, %v2019_v49 }
0x2da2   :  { %4527 = vtanh.f32 %v2029_v14 }
0x2dac   :  { %v4528_v51 = vpop.eup %4527 }
0x2dad   :  { %2032 = vrot.lane.b32.xlu0 %v4528_v51, %s4614_s18 }
0x2e1f   :  { %v2033_v59 = vpop.permute.xlu0 %2032 }
0x2e20   :  { %v2035_v52 = vmul.f32 %v2033_v59, %v2018_v47 }
0x2e22   :  { %2038 = vrot.lane.b32.xlu1 %v2035_v52, %s4617_s19 }
0x2e94   :  { %v2039_v53 = vpop.permute.xlu1 %2038 }
0x2e95   :  { %4045 = vmatmul.mubr.msk.f32.vlgmr.msra.gmra.mrb[18].mxu0 %vm467_vm3, %v2039_v53 }
0x2e96   :  { %4305 = vmatpush3.bf16.msra.mxu0 %v4716_v17  ;;  %4055 = vmatprep.mubr.msk.f32.mxu0 %vm4613_vm1, %v4612_v2 }
0x2e97   :  { %4306 = vmatprep.subr.bf16.mxu0 %v4615_v16 }
0x2e9a   :  { %4308 = vmatpush3.bf16.msra.mxu0 %v4752_v27 }
0x2e9b   :  { %4309 = vmatprep.subr.bf16.mxu0 %v4615_v16 }
0x2f68   :  { %v2108_v55 = vpop.f32.mrb[18].mxu0 }
0x2f69   :  { %v2112_v56 = vadd.f32 %v2108_v55, %v322_v54  ;;  %v4046_v58 = vpop.f32.mrb[19].mxu0 }
0x2f6b   :  { %v2113_v9 = vmul.f32 %v5163_v23, %v2112_v56 }
0x2f6d   :  { %4529 = vtanh.f32 %v2113_v9 }
0x2f77   :  { %v4530_v60 = vpop.eup %4529 }
0x2f78   :  { %v2115_v62 = vmul.f32 %v5163_v23, %v4530_v60  ;;  %v337_v60 = vadd.f32 %v5156_v10, %v4950_v24 }
0x2f7a   :  { %v2116_v63 = vadd.f32 %v5170_v30, %v2115_v62 }
0x2f7c   :  { %2119 = vrot.lane.b32.xlu0 %v2116_v63, %s4614_s18  ;;  %v2117_v8 = vmul.f32 %v2116_v63, %v2029_v14 }
0x2fee   :  { %v2120_v1 = vpop.permute.xlu0 %2119 }
0x2fef   :  { %v2122_v6 = vmul.f32 %v2120_v1, %v2116_v63 }
0x2ff1   :  { %2124 = vrot.lane.b32.xlu1 %v2122_v6, %s4617_s19 }
0x3063   :  { %v2125_v3 = vpop.permute.xlu1 %2124 }
0x3064   :  { %v2127_v18 = vadd.f32 %v2125_v3, %v2117_v8 }
0x3066   :  { %4531 = vtanh.f32 %v2127_v18 }
0x3070   :  { %v4532_v4 = vpop.eup %4531 }
0x3071   :  { %2130 = vrot.lane.b32.xlu0 %v4532_v4, %s4614_s18 }
0x30e3   :  { %v2131_v11 = vpop.permute.xlu0 %2130 }
0x30e4   :  { %v2133_v13 = vmul.f32 %v2131_v11, %v2116_v63 }
0x30e6   :  { %2136 = vrot.lane.b32.xlu1 %v2133_v13, %s4617_s19 }
0x3158   :  { %v2137_v5 = vpop.permute.xlu1 %2136 }
0x3159   :  { %4056 = vmatmul.mubr.msk.f32.vlgmr.msra.gmra.mrb[20].mxu0 %vm467_vm3, %v2137_v5 }
0x315a   :  { %4311 = vmatpush3.bf16.msra.mxu0 %v4716_v17  ;;  %4066 = vmatprep.mubr.msk.f32.mxu0 %vm4613_vm1, %v4612_v2 }
0x315b   :  { %4312 = vmatprep.subr.bf16.mxu0 %v4615_v16 }
0x315e   :  { %4314 = vmatpush3.bf16.msra.mxu0 %v4752_v27 }
0x315f   :  { %4315 = vmatprep.subr.bf16.mxu0 %v4615_v16 }
0x322c   :  { %v2206_v19 = vpop.f32.mrb[20].mxu0 }
0x322d   :  { %v2210_v61 = vadd.f32 %v2206_v19, %v327_v15  ;;  %v4057_v21 = vpop.f32.mrb[21].mxu0 }
0x322f   :  { %v2211_v57 = vmul.f32 %v5163_v23, %v2210_v61 }
0x3231   :  { %4533 = vtanh.f32 %v2211_v57  ;;  %v342_v57 = vadd.f32 %v5156_v10, %v4952_v26 }
0x323b   :  { %v4534_v12 = vpop.eup %4533 }
0x323c   :  { %v2213_v25 = vmul.f32 %v5163_v23, %v4534_v12 }
0x323e   :  { %v2214_v28 = vadd.f32 %v5170_v30, %v2213_v25 }
0x3240   :  { %2217 = vrot.lane.b32.xlu0 %v2214_v28, %s4614_s18  ;;  %v2215_v34 = vmul.f32 %v2214_v28, %v2127_v18 }
0x32b2   :  { %v2218_v7 = vpop.permute.xlu0 %2217 }
0x32b3   :  { %v2220_v32 = vmul.f32 %v2218_v7, %v2214_v28 }
0x32b5   :  { %2222 = vrot.lane.b32.xlu1 %v2220_v32, %s4617_s19 }
0x3327   :  { %v2223_v36 = vpop.permute.xlu1 %2222 }
0x3328   :  { %v2225_v20 = vadd.f32 %v2223_v36, %v2215_v34 }
0x332a   :  { %4535 = vtanh.f32 %v2225_v20 }
0x3334   :  { %v4536_v38 = vpop.eup %4535 }
0x3335   :  { %2228 = vrot.lane.b32.xlu0 %v4536_v38, %s4614_s18 }
0x33a7   :  { %v2229_v40 = vpop.permute.xlu0 %2228 }
0x33a8   :  { %v2231_v42 = vmul.f32 %v2229_v40, %v2214_v28 }
0x33aa   :  { %2234 = vrot.lane.b32.xlu1 %v2231_v42, %s4617_s19 }
0x341c   :  { %v2235_v44 = vpop.permute.xlu1 %2234 }
0x341d   :  { %4067 = vmatmul.mubr.msk.f32.vlgmr.msra.gmra.mrb[22].mxu0 %vm467_vm3, %v2235_v44 }
0x341e   :  { %4317 = vmatpush3.bf16.msra.mxu0 %v4716_v17  ;;  %4077 = vmatprep.mubr.msk.f32.mxu0 %vm4613_vm1, %v4612_v2 }
0x341f   :  { %4318 = vmatprep.subr.bf16.mxu0 %v4615_v16 }
0x3422   :  { %4320 = vmatpush3.bf16.msra.mxu0 %v4752_v27 }
0x3423   :  { %4321 = vmatprep.subr.bf16.mxu0 %v4615_v16 }
0x34f0   :  { %v2304_v47 = vpop.f32.mrb[22].mxu0 }
0x34f1   :  { %v2308_v48 = vadd.f32 %v2304_v47, %v332_v46  ;;  %v4068_v0 = vpop.f32.mrb[23].mxu0 }
0x34f2   :  { %v347_v0 = vadd.f32 %v5156_v10, %v4954_v29 }
0x34f3   :  { %v2309_v49 = vmul.f32 %v5163_v23, %v2308_v48 }
0x34f5   :  { %4537 = vtanh.f32 %v2309_v49 }
0x34ff   :  { %v4538_v50 = vpop.eup %4537 }
0x3500   :  { %v2311_v14 = vmul.f32 %v5163_v23, %v4538_v50 }
0x3502   :  { %v2312_v51 = vadd.f32 %v5170_v30, %v2311_v14 }
0x3504   :  { %2315 = vrot.lane.b32.xlu0 %v2312_v51, %s4614_s18  ;;  %v2313_v53 = vmul.f32 %v2312_v51, %v2225_v20 }
0x3576   :  { %v2316_v59 = vpop.permute.xlu0 %2315 }
0x3577   :  { %v2318_v52 = vmul.f32 %v2316_v59, %v2312_v51 }
0x3579   :  { %2320 = vrot.lane.b32.xlu1 %v2318_v52, %s4617_s19 }
0x35eb   :  { %v2321_v54 = vpop.permute.xlu1 %2320 }
0x35ec   :  { %v2323_v22 = vadd.f32 %v2321_v54, %v2313_v53 }
0x35ee   :  { %4539 = vtanh.f32 %v2323_v22 }
0x35f8   :  { %v4540_v55 = vpop.eup %4539 }
0x35f9   :  { %2326 = vrot.lane.b32.xlu0 %v4540_v55, %s4614_s18 }
0x366b   :  { %v2327_v56 = vpop.permute.xlu0 %2326 }
0x366c   :  { %v2329_v58 = vmul.f32 %v2327_v56, %v2312_v51 }
0x366e   :  { %2332 = vrot.lane.b32.xlu1 %v2329_v58, %s4617_s19 }
0x36e0   :  { %v2333_v9 = vpop.permute.xlu1 %2332 }
0x36e1   :  { %4078 = vmatmul.mubr.msk.f32.vlgmr.msra.gmra.mrb[24].mxu0 %vm467_vm3, %v2333_v9 }
0x36e2   :  { %4323 = vmatpush3.bf16.msra.mxu0 %v4716_v17  ;;  %4088 = vmatprep.mubr.msk.f32.mxu0 %vm4613_vm1, %v4612_v2 }
0x36e3   :  { %4324 = vmatprep.subr.bf16.mxu0 %v4615_v16 }
0x36e6   :  { %4326 = vmatpush3.bf16.msra.mxu0 %v4752_v27 }
0x36e7   :  { %4327 = vmatprep.subr.bf16.mxu0 %v4615_v16 }
0x37b4   :  { %v2402_v62 = vpop.f32.mrb[24].mxu0 }
0x37b5   :  { %v2406_v63 = vadd.f32 %v2402_v62, %v337_v60  ;;  %v4079_v1 = vpop.f32.mrb[25].mxu0 }
0x37b7   :  { %v2407_v6 = vmul.f32 %v5163_v23, %v2406_v63  ;;  %v352_v63 = vadd.f32 %v5156_v10, %v4956_v31 }
0x37b9   :  { %4541 = vtanh.f32 %v2407_v6 }
0x37c3   :  { %v4542_v8 = vpop.eup %4541 }
0x37c4   :  { %v2409_v3 = vmul.f32 %v5163_v23, %v4542_v8 }
0x37c6   :  { %v2410_v18 = vadd.f32 %v5170_v30, %v2409_v3 }
0x37c8   :  { %2413 = vrot.lane.b32.xlu0 %v2410_v18, %s4614_s18  ;;  %v2411_v13 = vmul.f32 %v2410_v18, %v2323_v22 }
0x383a   :  { %v2414_v4 = vpop.permute.xlu0 %2413 }
0x383b   :  { %v2416_v11 = vmul.f32 %v2414_v4, %v2410_v18 }
0x383d   :  { %2418 = vrot.lane.b32.xlu1 %v2416_v11, %s4617_s19 }
0x38af   :  { %v2419_v5 = vpop.permute.xlu1 %2418 }
0x38b0   :  { %v2421_v24 = vadd.f32 %v2419_v5, %v2411_v13 }
0x38b2   :  { %4543 = vtanh.f32 %v2421_v24 }
0x38bc   :  { %v4544_v15 = vpop.eup %4543 }
0x38bd   :  { %2424 = vrot.lane.b32.xlu0 %v4544_v15, %s4614_s18 }
0x392f   :  { %v2425_v19 = vpop.permute.xlu0 %2424 }
0x3930   :  { %v2427_v61 = vmul.f32 %v2425_v19, %v2410_v18 }
0x3932   :  { %2430 = vrot.lane.b32.xlu1 %v2427_v61, %s4617_s19 }
0x39a4   :  { %v2431_v21 = vpop.permute.xlu1 %2430 }
0x39a5   :  { %4089 = vmatmul.mubr.msk.f32.vlgmr.msra.gmra.mrb[26].mxu0 %vm467_vm3, %v2431_v21 }
0x39a6   :  { %4329 = vmatpush3.bf16.msra.mxu0 %v4716_v17  ;;  %4099 = vmatprep.mubr.msk.f32.mxu0 %vm4613_vm1, %v4612_v2 }
0x39a7   :  { %4330 = vmatprep.subr.bf16.mxu0 %v4615_v16 }
0x39aa   :  { %4332 = vmatpush3.bf16.msra.mxu0 %v4752_v27 }
0x39ab   :  { %4333 = vmatprep.subr.bf16.mxu0 %v4615_v16 }
0x3a78   :  { %v2500_v12 = vpop.f32.mrb[26].mxu0 }
0x3a79   :  { %v2504_v25 = vadd.f32 %v2500_v12, %v342_v57  ;;  %v4090_v28 = vpop.f32.mrb[27].mxu0  ;;  %v357_v12 = vadd.f32 %v5156_v10, %v4958_v33 }
0x3a7b   :  { %v2505_v7 = vmul.f32 %v5163_v23, %v2504_v25 }
0x3a7d   :  { %4545 = vtanh.f32 %v2505_v7 }
0x3a87   :  { %v4546_v32 = vpop.eup %4545 }
0x3a88   :  { %v2507_v34 = vmul.f32 %v5163_v23, %v4546_v32 }
0x3a8a   :  { %v2508_v36 = vadd.f32 %v5170_v30, %v2507_v34 }
0x3a8c   :  { %2511 = vrot.lane.b32.xlu0 %v2508_v36, %s4614_s18  ;;  %v2509_v40 = vmul.f32 %v2508_v36, %v2421_v24 }
0x3afe   :  { %v2512_v20 = vpop.permute.xlu0 %2511 }
0x3aff   :  { %v2514_v38 = vmul.f32 %v2512_v20, %v2508_v36 }
0x3b01   :  { %2516 = vrot.lane.b32.xlu1 %v2514_v38, %s4617_s19 }
0x3b73   :  { %v2517_v42 = vpop.permute.xlu1 %2516 }
0x3b74   :  { %v2519_v26 = vadd.f32 %v2517_v42, %v2509_v40 }
0x3b76   :  { %4547 = vtanh.f32 %v2519_v26 }
0x3b80   :  { %v4548_v44 = vpop.eup %4547 }
0x3b81   :  { %2522 = vrot.lane.b32.xlu0 %v4548_v44, %s4614_s18 }
0x3bf3   :  { %v2523_v46 = vpop.permute.xlu0 %2522 }
0x3bf4   :  { %v2525_v47 = vmul.f32 %v2523_v46, %v2508_v36 }
0x3bf6   :  { %2528 = vrot.lane.b32.xlu1 %v2525_v47, %s4617_s19 }
0x3c68   :  { %v2529_v48 = vpop.permute.xlu1 %2528 }
0x3c69   :  { %4100 = vmatmul.mubr.msk.f32.vlgmr.msra.gmra.mrb[28].mxu0 %vm467_vm3, %v2529_v48 }
0x3c6a   :  { %4335 = vmatpush3.bf16.msra.mxu0 %v4716_v17  ;;  %4110 = vmatprep.mubr.msk.f32.mxu0 %vm4613_vm1, %v4612_v2 }
0x3c6b   :  { %4336 = vmatprep.subr.bf16.mxu0 %v4615_v16 }
0x3c6e   :  { %4338 = vmatpush3.bf16.msra.mxu0 %v4752_v27 }
0x3c6f   :  { %4339 = vmatprep.subr.bf16.mxu0 %v4615_v16 }
0x3d3c   :  { %v2598_v49 = vpop.f32.mrb[28].mxu0 }
0x3d3d   :  { %v2602_v50 = vadd.f32 %v2598_v49, %v347_v0  ;;  %v4101_v14 = vpop.f32.mrb[29].mxu0  ;;  %v362_v0 = vadd.f32 %v5156_v10, %v4960_v35 }
0x3d3f   :  { %v2603_v51 = vmul.f32 %v5163_v23, %v2602_v50 }
0x3d41   :  { %4549 = vtanh.f32 %v2603_v51 }
0x3d4b   :  { %v4550_v59 = vpop.eup %4549 }
0x3d4c   :  { %v2605_v52 = vmul.f32 %v5163_v23, %v4550_v59 }
0x3d4e   :  { %v2606_v53 = vadd.f32 %v5170_v30, %v2605_v52 }
0x3d50   :  { %2609 = vrot.lane.b32.xlu0 %v2606_v53, %s4614_s18  ;;  %v2607_v55 = vmul.f32 %v2606_v53, %v2519_v26 }
0x3dc2   :  { %v2610_v54 = vpop.permute.xlu0 %2609 }
0x3dc3   :  { %v2612_v22 = vmul.f32 %v2610_v54, %v2606_v53 }
0x3dc5   :  { %2614 = vrot.lane.b32.xlu1 %v2612_v22, %s4617_s19 }
0x3e37   :  { %v2615_v56 = vpop.permute.xlu1 %2614 }
0x3e38   :  { %v2617_v29 = vadd.f32 %v2615_v56, %v2607_v55 }
0x3e3a   :  { %4551 = vtanh.f32 %v2617_v29 }
0x3e44   :  { %v4552_v58 = vpop.eup %4551 }
0x3e45   :  { %2620 = vrot.lane.b32.xlu0 %v4552_v58, %s4614_s18 }
0x3eb7   :  { %v2621_v9 = vpop.permute.xlu0 %2620 }
0x3eb8   :  { %v2623_v60 = vmul.f32 %v2621_v9, %v2606_v53 }
0x3eba   :  { %2626 = vrot.lane.b32.xlu1 %v2623_v60, %s4617_s19 }
0x3f2c   :  { %v2627_v62 = vpop.permute.xlu1 %2626 }
0x3f2d   :  { %4111 = vmatmul.mubr.msk.f32.vlgmr.msra.gmra.mrb[30].mxu0 %vm467_vm3, %v2627_v62  ;;  %v367_v62 = vadd.f32 %v5156_v10, %v4962_v37 }
0x3f2e   :  { %4341 = vmatpush3.bf16.msra.mxu0 %v4716_v17  ;;  %4121 = vmatprep.mubr.msk.f32.mxu0 %vm4613_vm1, %v4612_v2 }
0x3f2f   :  { %4342 = vmatprep.subr.bf16.mxu0 %v4615_v16 }
0x3f32   :  { %4344 = vmatpush3.bf16.msra.mxu0 %v4752_v27 }
0x3f33   :  { %4345 = vmatprep.subr.bf16.mxu0 %v4615_v16 }
0x4000   :  { %v2696_v1 = vpop.f32.mrb[30].mxu0 }
0x4001   :  { %v2700_v6 = vadd.f32 %v2696_v1, %v352_v63  ;;  %v4112_v8 = vpop.f32.mrb[31].mxu0 }
0x4003   :  { %v2701_v3 = vmul.f32 %v5163_v23, %v2700_v6 }
0x4005   :  { %4553 = vtanh.f32 %v2701_v3 }
0x400f   :  { %v4554_v18 = vpop.eup %4553 }
0x4010   :  { %v2703_v4 = vmul.f32 %v5163_v23, %v4554_v18 }
0x4012   :  { %v2704_v11 = vadd.f32 %v5170_v30, %v2703_v4 }
0x4014   :  { %2707 = vrot.lane.b32.xlu0 %v2704_v11, %s4614_s18  ;;  %v2705_v24 = vmul.f32 %v2704_v11, %v2617_v29 }
0x4086   :  { %v2708_v13 = vpop.permute.xlu0 %2707 }
0x4087   :  { %v2710_v5 = vmul.f32 %v2708_v13, %v2704_v11 }
0x4089   :  { %2712 = vrot.lane.b32.xlu1 %v2710_v5, %s4617_s19 }
0x40fb   :  { %v2713_v15 = vpop.permute.xlu1 %2712 }
0x40fc   :  { %v2715_v31 = vadd.f32 %v2713_v15, %v2705_v24 }
0x40fe   :  { %4555 = vtanh.f32 %v2715_v31 }
0x4108   :  { %v4556_v19 = vpop.eup %4555 }
0x4109   :  { %2718 = vrot.lane.b32.xlu0 %v4556_v19, %s4614_s18 }
0x417b   :  { %v2719_v61 = vpop.permute.xlu0 %2718 }
0x417c   :  { %v2721_v21 = vmul.f32 %v2719_v61, %v2704_v11 }
0x417e   :  { %2724 = vrot.lane.b32.xlu1 %v2721_v21, %s4617_s19  ;;  %v372_v21 = vadd.f32 %v5156_v10, %v4964_v39 }
0x41f0   :  { %v2725_v57 = vpop.permute.xlu1 %2724 }
0x41f1   :  { %4122 = vmatmul.mubr.msk.f32.vlgmr.msra.gmra.mrb[32].mxu0 %vm467_vm3, %v2725_v57 }
0x41f2   :  { %4347 = vmatpush3.bf16.msra.mxu0 %v4716_v17  ;;  %4132 = vmatprep.mubr.msk.f32.mxu0 %vm4613_vm1, %v4612_v2 }
0x41f3   :  { %4348 = vmatprep.subr.bf16.mxu0 %v4615_v16 }
0x41f6   :  { %4350 = vmatpush3.bf16.msra.mxu0 %v4752_v27 }
0x41f7   :  { %4351 = vmatprep.subr.bf16.mxu0 %v4615_v16 }
0x42c4   :  { %v2794_v25 = vpop.f32.mrb[32].mxu0 }
0x42c5   :  { %v2798_v28 = vadd.f32 %v2794_v25, %v357_v12  ;;  %v4123_v7 = vpop.f32.mrb[33].mxu0 }
0x42c7   :  { %v2799_v32 = vmul.f32 %v5163_v23, %v2798_v28 }
0x42c9   :  { %4557 = vtanh.f32 %v2799_v32 }
0x42d3   :  { %v4558_v34 = vpop.eup %4557 }
0x42d4   :  { %v2801_v36 = vmul.f32 %v5163_v23, %v4558_v34 }
0x42d6   :  { %v2802_v20 = vadd.f32 %v5170_v30, %v2801_v36 }
0x42d8   :  { %2805 = vrot.lane.b32.xlu0 %v2802_v20, %s4614_s18  ;;  %v2803_v42 = vmul.f32 %v2802_v20, %v2715_v31 }
0x434a   :  { %v2806_v38 = vpop.permute.xlu0 %2805 }
0x434b   :  { %v2808_v40 = vmul.f32 %v2806_v38, %v2802_v20 }
0x434d   :  { %2810 = vrot.lane.b32.xlu1 %v2808_v40, %s4617_s19 }
0x43bf   :  { %v2811_v26 = vpop.permute.xlu1 %2810 }
0x43c0   :  { %v2813_v33 = vadd.f32 %v2811_v26, %v2803_v42 }
0x43c2   :  { %4559 = vtanh.f32 %v2813_v33 }
0x43cc   :  { %v4560_v44 = vpop.eup %4559 }
0x43cd   :  { %2816 = vrot.lane.b32.xlu0 %v4560_v44, %s4614_s18 }
0x443f   :  { %v2817_v46 = vpop.permute.xlu0 %2816 }
0x4440   :  { %v2819_v47 = vmul.f32 %v2817_v46, %v2802_v20  ;;  %v377_v46 = vadd.f32 %v5156_v10, %v4966_v41 }
0x4442   :  { %2822 = vrot.lane.b32.xlu1 %v2819_v47, %s4617_s19 }
0x44b4   :  { %v2823_v48 = vpop.permute.xlu1 %2822 }
0x44b5   :  { %4133 = vmatmul.mubr.msk.f32.vlgmr.msra.gmra.mrb[34].mxu0 %vm467_vm3, %v2823_v48 }
0x44b6   :  { %4353 = vmatpush3.bf16.msra.mxu0 %v4716_v17  ;;  %4143 = vmatprep.mubr.msk.f32.mxu0 %vm4613_vm1, %v4612_v2 }
0x44b7   :  { %4354 = vmatprep.subr.bf16.mxu0 %v4615_v16 }
0x44ba   :  { %4356 = vmatpush3.bf16.msra.mxu0 %v4752_v27 }
0x44bb   :  { %4357 = vmatprep.subr.bf16.mxu0 %v4615_v16 }
0x4588   :  { %v2892_v49 = vpop.f32.mrb[34].mxu0 }
0x4589   :  { %v2896_v50 = vadd.f32 %v2892_v49, %v362_v0  ;;  %v4134_v14 = vpop.f32.mrb[35].mxu0 }
0x458b   :  { %v2897_v51 = vmul.f32 %v5163_v23, %v2896_v50 }
0x458d   :  { %4561 = vtanh.f32 %v2897_v51 }
0x4597   :  { %v4562_v59 = vpop.eup %4561 }
0x4598   :  { %v2899_v52 = vmul.f32 %v5163_v23, %v4562_v59 }
0x459a   :  { %v2900_v53 = vadd.f32 %v5170_v30, %v2899_v52 }
0x459c   :  { %2903 = vrot.lane.b32.xlu0 %v2900_v53, %s4614_s18  ;;  %v2901_v55 = vmul.f32 %v2900_v53, %v2813_v33 }
0x460e   :  { %v2904_v54 = vpop.permute.xlu0 %2903 }
0x460f   :  { %v2906_v22 = vmul.f32 %v2904_v54, %v2900_v53 }
0x4611   :  { %2908 = vrot.lane.b32.xlu1 %v2906_v22, %s4617_s19 }
0x4683   :  { %v2909_v56 = vpop.permute.xlu1 %2908 }
0x4684   :  { %v2911_v35 = vadd.f32 %v2909_v56, %v2901_v55 }
0x4686   :  { %4563 = vtanh.f32 %v2911_v35 }
0x4690   :  { %v4564_v29 = vpop.eup %4563 }
0x4691   :  { %2914 = vrot.lane.b32.xlu0 %v4564_v29, %s4614_s18  ;;  %v382_v29 = vadd.f32 %v5156_v10, %v4968_v43 }
0x4703   :  { %v2915_v58 = vpop.permute.xlu0 %2914 }
0x4704   :  { %v2917_v9 = vmul.f32 %v2915_v58, %v2900_v53 }
0x4706   :  { %2920 = vrot.lane.b32.xlu1 %v2917_v9, %s4617_s19 }
0x4778   :  { %v2921_v60 = vpop.permute.xlu1 %2920 }
0x4779   :  { %4144 = vmatmul.mubr.msk.f32.vlgmr.msra.gmra.mrb[36].mxu0 %vm467_vm3, %v2921_v60 }
0x477a   :  { %4359 = vmatpush3.bf16.msra.mxu0 %v4716_v17  ;;  %4154 = vmatprep.mubr.msk.f32.mxu0 %vm4613_vm1, %v4612_v2 }
0x477b   :  { %4360 = vmatprep.subr.bf16.mxu0 %v4615_v16 }
0x477e   :  { %4362 = vmatpush3.bf16.msra.mxu0 %v4752_v27 }
0x477f   :  { %4363 = vmatprep.subr.bf16.mxu0 %v4615_v16 }
0x484c   :  { %v2990_v63 = vpop.f32.mrb[36].mxu0 }
0x484d   :  { %v2994_v1 = vadd.f32 %v2990_v63, %v367_v62  ;;  %v4145_v6 = vpop.f32.mrb[37].mxu0 }
0x484f   :  { %v2995_v8 = vmul.f32 %v5163_v23, %v2994_v1 }
0x4851   :  { %4565 = vtanh.f32 %v2995_v8 }
0x485b   :  { %v4566_v3 = vpop.eup %4565 }
0x485c   :  { %v2997_v18 = vmul.f32 %v5163_v23, %v4566_v3 }
0x485e   :  { %v2998_v4 = vadd.f32 %v5170_v30, %v2997_v18 }
0x4860   :  { %3001 = vrot.lane.b32.xlu0 %v2998_v4, %s4614_s18  ;;  %v2999_v5 = vmul.f32 %v2998_v4, %v2911_v35 }
0x48d2   :  { %v3002_v11 = vpop.permute.xlu0 %3001 }
0x48d3   :  { %v3004_v13 = vmul.f32 %v3002_v11, %v2998_v4 }
0x48d5   :  { %3006 = vrot.lane.b32.xlu1 %v3004_v13, %s4617_s19  ;;  %v387_v13 = vadd.f32 %v5156_v10, %v4970_v45  ;;  %v3408_v10 = vld [vmem:[%s5478_s7] sm:$0xff] }
0x4947   :  { %v3007_v24 = vpop.permute.xlu1 %3006 }
0x4948   :  { %v3009_v37 = vadd.f32 %v3007_v24, %v2999_v5 }
0x494a   :  { %4567 = vtanh.f32 %v3009_v37 }
0x4954   :  { %v4568_v15 = vpop.eup %4567 }
0x4955   :  { %3012 = vrot.lane.b32.xlu0 %v4568_v15, %s4614_s18 }
0x49c7   :  { %v3013_v31 = vpop.permute.xlu0 %3012 }
0x49c8   :  { %v3015_v19 = vmul.f32 %v3013_v31, %v2998_v4 }
0x49ca   :  { %3018 = vrot.lane.b32.xlu1 %v3015_v19, %s4617_s19 }
0x4a3c   :  { %v3019_v61 = vpop.permute.xlu1 %3018 }
0x4a3d   :  { %4155 = vmatmul.mubr.msk.f32.vlgmr.msra.gmra.mrb[38].mxu0 %vm467_vm3, %v3019_v61 }
0x4a3e   :  { %4365 = vmatpush3.bf16.msra.mxu0 %v4716_v17  ;;  %4165 = vmatprep.mubr.msk.f32.mxu0 %vm4613_vm1, %v4612_v2 }
0x4a3f   :  { %4366 = vmatprep.subr.bf16.mxu0 %v4615_v16 }
0x4a42   :  { %4368 = vmatpush3.bf16.msra.mxu0 %v4752_v27 }
0x4a43   :  { %4369 = vmatprep.subr.bf16.mxu0 %v4615_v16 }
0x4b10   :  { %v3088_v57 = vpop.f32.mrb[38].mxu0 }
0x4b11   :  { %v3092_v12 = vadd.f32 %v3088_v57, %v372_v21  ;;  %v4156_v25 = vpop.f32.mrb[39].mxu0 }
0x4b13   :  { %v3093_v28 = vmul.f32 %v5163_v23, %v3092_v12 }
0x4b15   :  { %4569 = vtanh.f32 %v3093_v28 }
0x4b1f   :  { %v4570_v7 = vpop.eup %4569 }
0x4b20   :  { %v3095_v32 = vmul.f32 %v5163_v23, %v4570_v7  ;;  %v3411_v7 = vld [vmem:[%s5478_s7 + $0x18] sm:$0xff] }
0x4b22   :  { %v3096_v34 = vadd.f32 %v5170_v30, %v3095_v32 }
0x4b24   :  { %3099 = vrot.lane.b32.xlu0 %v3096_v34, %s4614_s18  ;;  %v3097_v38 = vmul.f32 %v3096_v34, %v3009_v37 }
0x4b96   :  { %v3100_v36 = vpop.permute.xlu0 %3099 }
0x4b97   :  { %v3102_v20 = vmul.f32 %v3100_v36, %v3096_v34 }
0x4b99   :  { %3104 = vrot.lane.b32.xlu1 %v3102_v20, %s4617_s19 }
0x4c0b   :  { %v3105_v40 = vpop.permute.xlu1 %3104 }
0x4c0c   :  { %v3107_v39 = vadd.f32 %v3105_v40, %v3097_v38  ;;  %v3576_v40 = vld [vmem:[%s5479_s8] ss:$0 sm:$0xff] }
0x4c0e   :  { %4571 = vtanh.f32 %v3107_v39 }
0x4c18   :  { %v4572_v42 = vpop.eup %4571 }
0x4c19   :  { %3110 = vrot.lane.b32.xlu0 %v4572_v42, %s4614_s18 }
0x4c8b   :  { %v3111_v26 = vpop.permute.xlu0 %3110 }
0x4c8c   :  { %v3113_v33 = vmul.f32 %v3111_v26, %v3096_v34 }
0x4c8e   :  { %3116 = vrot.lane.b32.xlu1 %v3113_v33, %s4617_s19 }
0x4d00   :  { %v3117_v44 = vpop.permute.xlu1 %3116 }
0x4d01   :  { %4166 = vmatmul.mubr.msk.f32.vlgmr.msra.gmra.mrb[40].mxu0 %vm467_vm3, %v3117_v44 }
0x4d02   :  { %4371 = vmatpush3.bf16.msra.mxu0 %v4716_v17  ;;  %4176 = vmatprep.mubr.msk.f32.mxu0 %vm4613_vm1, %v4612_v2 }
0x4d03   :  { %4372 = vmatprep.subr.bf16.mxu0 %v4615_v16 }
0x4d06   :  { %4374 = vmatpush3.bf16.msra.mxu0 %v4752_v27 }
0x4d07   :  { %4375 = vmatprep.subr.bf16.mxu0 %v4615_v16 }
0x4dd4   :  { %v3186_v47 = vpop.f32.mrb[40].mxu0 }
0x4dd5   :  { %v3190_v48 = vadd.f32 %v3186_v47, %v377_v46  ;;  %v4167_v0 = vpop.f32.mrb[41].mxu0 }
0x4dd7   :  { %v3191_v49 = vmul.f32 %v5163_v23, %v3190_v48 }
0x4dd9   :  { %4573 = vtanh.f32 %v3191_v49 }
0x4de3   :  { %v4574_v50 = vpop.eup %4573 }
0x4de4   :  { %v3193_v14 = vmul.f32 %v5163_v23, %v4574_v50 }
0x4de6   :  { %v3194_v51 = vadd.f32 %v5170_v30, %v3193_v14 }
0x4de8   :  { %3197 = vrot.lane.b32.xlu0 %v3194_v51, %s4614_s18  ;;  %v3195_v53 = vmul.f32 %v3194_v51, %v3107_v39 }
0x4e5a   :  { %v3198_v59 = vpop.permute.xlu0 %3197 }
0x4e5b   :  { %v3200_v52 = vmul.f32 %v3198_v59, %v3194_v51 }
0x4e5d   :  { %3202 = vrot.lane.b32.xlu1 %v3200_v52, %s4617_s19 }
0x4ecf   :  { %v3203_v54 = vpop.permute.xlu1 %3202 }
0x4ed0   :  { %v3205_v41 = vadd.f32 %v3203_v54, %v3195_v53 }
0x4ed2   :  { %4575 = vtanh.f32 %v3205_v41 }
0x4edc   :  { %v4576_v22 = vpop.eup %4575 }
0x4edd   :  { %3208 = vrot.lane.b32.xlu0 %v4576_v22, %s4614_s18 }
0x4f4f   :  { %v3209_v55 = vpop.permute.xlu0 %3208 }
0x4f50   :  { %v3211_v56 = vmul.f32 %v3209_v55, %v3194_v51 }
0x4f52   :  { %3214 = vrot.lane.b32.xlu1 %v3211_v56, %s4617_s19 }
0x4fc4   :  { %v3215_v35 = vpop.permute.xlu1 %3214 }
0x4fc5   :  { %4177 = vmatmul.mubr.msk.f32.vlgmr.msra.gmra.mrb[42].mxu0 %vm467_vm3, %v3215_v35 }
0x4fc6   :  { %4377 = vmatpush3.bf16.msra.mxu0 %v4716_v17  ;;  %4187 = vmatprep.mubr.msk.f32.mxu0 %vm4613_vm1, %v4612_v2 }
0x4fc7   :  { %4378 = vmatprep.subr.bf16.mxu0 %v4615_v16 }
0x4fca   :  { %4380 = vmatpush3.bf16.msra.mxu0 %v4752_v27 }
0x5098   :  { %v3284_v58 = vpop.f32.mrb[42].mxu0 }
0x5099   :  { %v3288_v9 = vadd.f32 %v3284_v58, %v382_v29  ;;  %v4178_v60 = vpop.f32.mrb[43].mxu0 }
0x509b   :  { %v3289_v62 = vmul.f32 %v5163_v23, %v3288_v9 }
0x509d   :  { %4577 = vtanh.f32 %v3289_v62 }
0x50a7   :  { %v4578_v63 = vpop.eup %4577 }
0x50a8   :  { %v3291_v1 = vmul.f32 %v5163_v23, %v4578_v63 }
0x50aa   :  { %v3292_v17 = vadd.f32 %v5170_v30, %v3291_v1 }
0x50ac   :  { %3295 = vrot.lane.b32.xlu0 %v3292_v17, %s4614_s18  ;;  %v3293_v27 = vmul.f32 %v3292_v17, %v3205_v41 }
0x511e   :  { %v3296_v2 = vpop.permute.xlu0 %3295 }
0x511f   :  { %v3298_v6 = vmul.f32 %v3296_v2, %v3292_v17 }
0x5121   :  { %3300 = vrot.lane.b32.xlu1 %v3298_v6, %s4617_s19 }
0x5193   :  { %v3301_v8 = vpop.permute.xlu1 %3300 }
0x5194   :  { %v3303_v43 = vadd.f32 %v3301_v8, %v3293_v27 }
0x5196   :  { %4579 = vtanh.f32 %v3303_v43 }
0x51a0   :  { %v4580_v3 = vpop.eup %4579 }
0x51a1   :  { %3306 = vrot.lane.b32.xlu0 %v4580_v3, %s4614_s18 }
0x5213   :  { %v3307_v18 = vpop.permute.xlu0 %3306 }
0x5214   :  { %v3309_v4 = vmul.f32 %v3307_v18, %v3292_v17 }
0x5216   :  { %3312 = vrot.lane.b32.xlu1 %v3309_v4, %s4617_s19 }
0x5288   :  { %v3313_v11 = vpop.permute.xlu1 %3312 }
0x5289   :  { %4188 = vmatmul.mubr.msk.f32.vlgmr.msra.gmra.mrb[44].mxu0 %vm467_vm3, %v3313_v11 }
0x535c   :  { %v3382_v5 = vpop.f32.mrb[44].mxu0 }
0x535d   :  { %v3386_v24 = vadd.f32 %v3382_v5, %v387_v13  ;;  %v4189_v37 = vpop.f32.mrb[45].mxu0 }
0x535f   :  { %v3387_v15 = vmul.f32 %v5163_v23, %v3386_v24 }
0x5361   :  { %4581 = vtanh.f32 %v3387_v15 }
0x536b   :  { %v4582_v31 = vpop.eup %4581 }
0x536c   :  { %v3389_v19 = vmul.f32 %v5163_v23, %v4582_v31  ;;  %v3409_v23 = vld [vmem:[%s5478_s7 + $0x8] sm:$0xff] }
0x536d   :  { %v4382_v28 = vpack.c.bf16 %v3409_v23, %v3408_v10 }
0x536e   :  { %v3390_v61 = vadd.f32 %v5170_v30, %v3389_v19  ;;  %v3410_v30 = vld [vmem:[%s5478_s7 + $0x10] sm:$0xff]  ;;  %s4618_s7 = smov [#allocation3]  }
0x536f   :  { %4383 = vmatpush3.bf16.msra.mxu1 %v4382_v28  ;;  %v4385_v32 = vpack.c.bf16 %v3411_v7, %v3410_v30  ;;  %s3502_s13 = sshll.u32 %s4618_s7, 4  ;;  %s3503_s13 = int_to_ptr.vmem [resolvable:$true] %s3502_s13 }
0x5370   :  { %3393 = vrot.lane.b32.xlu0 %v3390_v61, %s4614_s18  ;;  %v3391_v12 = vmul.f32 %v3390_v61, %v3303_v43  ;;  %4384 = vmatprep.subr.bf16.mxu1 %v4615_v16  ;;  %p4593_p1 = scmp.lt.s32.totalorder %s3503_s13, %s3503_s13 }
0x5373   :  { %4386 = vmatpush3.bf16.msra.mxu1 %v4385_v32 }
0x53e2   :  { %v3394_v21 = vpop.permute.xlu0 %3393 }
0x53e3   :  { %v3396_v57 = vmul.f32 %v3394_v21, %v3390_v61 }
0x53e5   :  { %3398 = vrot.lane.b32.xlu1 %v3396_v57, %s4617_s19 }
0x5457   :  { %v3399_v25 = vpop.permute.xlu1 %3398 }
0x5458   :  { %v3401_v45 = vadd.f32 %v3399_v25, %v3391_v12 }
0x545a   :  { %4583 = vtanh.f32 %v3401_v45 }
0x5464   :  { %v4584_v34 = vpop.eup %4583 }
0x5465   :  { %3404 = vrot.lane.b32.xlu0 %v4584_v34, %s4614_s18  ;;  %s4588_s18 = scalar_lea.vmem %s3503_s13, 128 }
0x5466   :  { %p4589_p0 = scmp.ne.s32.totalorder %s3503_s13, %s4588_s18  ;;  %p4594_p2 = scmp.lt.s32.totalorder %s4588_s18, %s4588_s18 }
0x5468   :  { %p4595_p3 = por %p4594_p2, %p4593_p1 }
0x546a   :  { %p4596_p4 = pnand %p4595_p3, %p4589_p0 }
0x54d7   :  { %v3405_v36 = vpop.permute.xlu0 %3404 }
0x54d8   :  { %v3407_v20 = vmul.f32 %v3405_v36, %v3390_v61 }
0x54da   :  { %3420 = vrot.lane.b32.xlu1 %v3407_v20, %s4617_s19 }
0x554c   :  { %v3421_v38 = vpop.permute.xlu1 %3420 }
0x554d   :  { %4199 = vmatmul.mubr.msk.f32.vlgmr.msra.gmra.mrb[62].mxu1 %vm467_vm3, %v3421_v38 }
0x5620   :  { %v3490_v39 = vpop.f32.mrb[62].mxu1 }
0x5621   :  { %v3491_v16 = vadd.f32 %v3576_v40, %v3490_v39  ;;  %v4200_v42 = vpop.f32.mrb[63].mxu1 }
0x5623   :  { %3495 = vst.msk [vmem:[#allocation3] sm:$0xff] %vm3494_vm4, %v3491_v16 }
0x5624   :  { %4599 = shalt.err (!%p4596_p4)
}
0x5625   :  { %s4600_s15 = scalar_lea.hbm %s5480_s9, 128 }
0x5626   :  { %p4601_p5 = scmp.ne.s32.totalorder %s5480_s9, %s4600_s15  ;;  %p4604_p6 = scmp.lt.u32.totalorder %s4600_s15, %s5480_s9 }
0x5628   :  { %p4606_p7 = pnand %p4604_p6, %p4601_p5 }
0x562a   :  { %4609 = shalt.err (!%p4606_p7)
}
0x562b   :  { %3505 = dma.vmem_to_hbm [thread:$0]  %s3503_s13, 128, %s5480_s9, [#allocation4]  }
0x562c   :  { %4610 = dma.done.wait [#allocation4], 128  }
0x562d   :  { %4611 = vsyncadd [#allocation4], 4294967168 }
0x562e   :  { %3509 = vsyncpa [#allocation4], 1 }

</bundles_post_ra>
